<compile_context>
chip_gen: v7x
topology: tpu7x:2x2x1
jax: 0.10.0
libtpu: 0.0.40
codegen_flags: <defaults>
</compile_context>

<pallas_src>
import functools

import jax
import jax.numpy as jnp
from jax.experimental import pallas as pl
from jax.experimental.pallas import tpu as pltpu

IN_F = 784        # input / reconstruction features (28*28)
H1_F = 400        # encoder / decoder hidden width
LAT = 20          # latent dimension
HEAD_PAD = 128    # fused [mu | logvar] head padded to one full lane tile
OUT_PAD = 896     # 784 padded to 7*128 for lane-dense recon stores


def _round_up(x, m):
    return (x + m - 1) // m * m


def vae_forward_kernel(
    x_ref, eps_ref,
    w1_ref, b1_ref,
    wh_ref, bh_ref,
    w3_ref, b3_ref,
    w4_ref, b4_ref,
    recon_ref, head_ref,
):
    # encoder: h1 = relu(x @ W1 + b1)   (bf16 MXU operands, f32 accumulation)
    h1 = jnp.dot(x_ref[...], w1_ref[...], preferred_element_type=jnp.float32)
    h1 = jnp.maximum(h1 + b1_ref[...], 0.0)                      # (TM, 400) f32

    # fused heads: one matmul produces [mu | logvar | zeros] in 128 lanes.
    head = jnp.dot(h1.astype(jnp.bfloat16), wh_ref[...],
                   preferred_element_type=jnp.float32) + bh_ref[...]   # (TM, 128)
    head_ref[...] = head                      # lane-dense store; split in wrapper

    # reparameterize without unaligned lane slicing: rotate logvar (lanes 20..39)
    # onto lanes 0..19 so it lines up with mu. eps is zero-padded beyond lane 20
    # and W3's rows >= 20 are zero, so the junk lanes of z never contribute.
    logvar_aligned = pltpu.roll(head, shift=HEAD_PAD - LAT, axis=1)
    std = jnp.exp(0.5 * logvar_aligned)
    z = head + eps_ref[...] * std             # lanes 0..19 hold mu + eps * std

    # decoder: sigmoid(relu(z @ W3 + b3) @ W4 + b4), W4/b4 zero-padded to 896.
    h3 = jnp.dot(z.astype(jnp.bfloat16), w3_ref[...],
                 preferred_element_type=jnp.float32)
    h3 = jnp.maximum(h3 + b3_ref[...], 0.0)                      # (TM, 400) f32
    logits = jnp.dot(h3.astype(jnp.bfloat16), w4_ref[...],
                     preferred_element_type=jnp.float32) + b4_ref[...]
    recon_ref[...] = jax.nn.sigmoid(logits)                      # (TM, 896) f32


def prepare_params(params):
    """Pack PyTorch-layout (pre-transposed) f32 params into kernel-ready form."""
    (w1, b1, w21, b21, w22, b22, w3, b3, w4, b4) = params
    # fused [mu | logvar] head, zero-padded to a full 128-lane tile
    wh = jnp.pad(jnp.concatenate([w21, w22], axis=1), ((0, 0), (0, HEAD_PAD - 2 * LAT)))
    bh = jnp.pad(jnp.concatenate([b21, b22], axis=1), ((0, 0), (0, HEAD_PAD - 2 * LAT)))
    # decoder input padded to 128 rows (rows >= LAT are zero -> junk z lanes ignored)
    w3p = jnp.pad(w3, ((0, HEAD_PAD - LAT), (0, 0)))
    # decoder output padded to 896 lanes for lane-dense recon stores
    w4p = jnp.pad(w4, ((0, 0), (0, OUT_PAD - IN_F)))
    b4p = jnp.pad(b4, ((0, 0), (0, OUT_PAD - IN_F)))
    bf16 = jnp.bfloat16
    return (w1.astype(bf16), b1,
            wh.astype(bf16), bh,
            w3p.astype(bf16), b3,
            w4p.astype(bf16), b4p)


@jax.jit
def vae_forward(x_img, eps, kernel_params):
    """x_img: (B,1,28,28) f32, eps: (B,20) f32 -> (recon (B,784), mu (B,20), logvar (B,20))."""
    B = x_img.shape[0]
    x = x_img.reshape(B, IN_F).astype(jnp.bfloat16)      # x.view(-1, 784)

    # Batch tile: up to 256 MXU rows per grid step; round small batches up to the
    # 8-row sublane granularity. TODO(synk): prefer TM=128 on v5e (4x128 MXU).
    TM = min(256, _round_up(B, 8))
    Bp = _round_up(B, TM)

    x = jnp.pad(x, ((0, Bp - B), (0, 0)))
    eps_p = jnp.pad(eps, ((0, Bp - B), (0, HEAD_PAD - LAT)))

    (w1, b1, wh, bh, w3, b3, w4, b4) = kernel_params

    row = lambda i: (i, 0)      # activation tiles walk the batch
    const = lambda i: (0, 0)    # weights / biases stay VMEM-resident across steps

    flops = 2 * Bp * (IN_F * H1_F + H1_F * HEAD_PAD + HEAD_PAD * H1_F + H1_F * OUT_PAD)
    transcendentals = Bp * (OUT_PAD + HEAD_PAD)
    bytes_accessed = int(
        x.size * x.dtype.itemsize
        + eps_p.size * eps_p.dtype.itemsize
        + sum(int(p.size) * p.dtype.itemsize for p in kernel_params)
        + Bp * OUT_PAD * 4 + Bp * HEAD_PAD * 4)

    recon_p, head = pl.pallas_call(
        vae_forward_kernel,
        grid=(Bp // TM,),
        out_shape=(
            jax.ShapeDtypeStruct((Bp, OUT_PAD), jnp.float32),
            jax.ShapeDtypeStruct((Bp, HEAD_PAD), jnp.float32),
        ),
        in_specs=[
            pl.BlockSpec((TM, IN_F), row),          # x (bf16)
            pl.BlockSpec((TM, HEAD_PAD), row),      # eps (f32, zero-padded lanes)
            pl.BlockSpec((IN_F, H1_F), const),      # W1
            pl.BlockSpec((1, H1_F), const),         # b1
            pl.BlockSpec((H1_F, HEAD_PAD), const),  # W_head = [W21 | W22 | 0]
            pl.BlockSpec((1, HEAD_PAD), const),     # b_head
            pl.BlockSpec((HEAD_PAD, H1_F), const),  # W3 (rows >= 20 zero)
            pl.BlockSpec((1, H1_F), const),         # b3
            pl.BlockSpec((H1_F, OUT_PAD), const),   # W4 (lanes >= 784 zero)
            pl.BlockSpec((1, OUT_PAD), const),      # b4
        ],
        out_specs=(
            pl.BlockSpec((TM, OUT_PAD), row),
            pl.BlockSpec((TM, HEAD_PAD), row),
        ),
        compiler_params=pltpu.CompilerParams(
            dimension_semantics=("parallel",)),
        cost_estimate=pl.CostEstimate(
            flops=flops,
            transcendentals=transcendentals,
            bytes_accessed=bytes_accessed),
    )(x, eps_p, w1, b1, wh, bh, w3, b3, w4, b4)

    recon = recon_p[:B, :IN_F]
    mu = head[:B, :LAT]
    logvar = head[:B, LAT:2 * LAT]
    return recon, mu, logvar


def init_params(key):
    """PyTorch nn.Linear-style init (uniform +/- 1/sqrt(fan_in)); weights stored
    transposed as (in_features, out_features), biases as (1, out_features)."""
    dims = [(IN_F, H1_F), (H1_F, LAT), (H1_F, LAT), (LAT, H1_F), (H1_F, IN_F)]
    params = []
    for (fan_in, fan_out) in dims:
        key, kw, kb = jax.random.split(key, 3)
        bound = 1.0 / jnp.sqrt(jnp.float32(fan_in))
        w = jax.random.uniform(kw, (fan_in, fan_out), jnp.float32, -bound, bound)
        b = jax.random.uniform(kb, (1, fan_out), jnp.float32, -bound, bound)
        params.extend([w, b])
    return tuple(params)


def vae_reference(x_img, eps, params):
    (w1, b1, w21, b21, w22, b22, w3, b3, w4, b4) = params
    x = x_img.reshape(x_img.shape[0], IN_F)
    h1 = jax.nn.relu(x @ w1 + b1)
    mu = h1 @ w21 + b21
    logvar = h1 @ w22 + b22
    z = mu + eps * jnp.exp(0.5 * logvar)
    h3 = jax.nn.relu(z @ w3 + b3)
    return jax.nn.sigmoid(h3 @ w4 + b4), mu, logvar


if __name__ == "__main__":
    key = jax.random.PRNGKey(0)
    k_params, k_x, k_eps = jax.random.split(key, 3)

    B = 8
    x_img = jax.random.uniform(k_x, (B, 1, 28, 28), jnp.float32)   # MNIST-like NCHW
    # eps is the N(0,1) sample used in reparameterize (torch.randn_like(std)).
    eps = jax.random.normal(k_eps, (B, LAT), jnp.float32)

    params = init_params(k_params)
    kernel_params = prepare_params(params)

    recon, mu, logvar = vae_forward(x_img, eps, kernel_params)
    jax.block_until_ready((recon, mu, logvar))

    assert recon.shape == (B, IN_F) and mu.shape == (B, LAT) and logvar.shape == (B, LAT)
    assert bool(jnp.all(jnp.isfinite(recon)))
    assert bool(jnp.all((recon >= 0.0) & (recon <= 1.0)))
    assert bool(jnp.all(jnp.isfinite(mu))) and bool(jnp.all(jnp.isfinite(logvar)))

    # correctness vs. pure-f32 reference (loose tolerance for bf16 MXU operands)
    recon_r, mu_r, logvar_r = vae_reference(x_img, eps, params)
    assert bool(jnp.allclose(mu, mu_r, atol=5e-2)), float(jnp.max(jnp.abs(mu - mu_r)))
    assert bool(jnp.allclose(logvar, logvar_r, atol=5e-2)), float(jnp.max(jnp.abs(logvar - logvar_r)))
    assert bool(jnp.allclose(recon, recon_r, atol=5e-2)), float(jnp.max(jnp.abs(recon - recon_r)))

    print("KERNEL_OK")
</pallas_src>

<mosaic_0001>
module attributes {stable_mosaic.version = 11 : i64} {
  func.func @vae_forward_kernel(%arg0: i32, %arg1: memref<8x784xbf16, #tpu.memory_space<vmem>>, %arg2: memref<8x128xf32, #tpu.memory_space<vmem>>, %arg3: memref<784x400xbf16, #tpu.memory_space<vmem>>, %arg4: memref<1x400xf32, #tpu.memory_space<vmem>>, %arg5: memref<400x128xbf16, #tpu.memory_space<vmem>>, %arg6: memref<1x128xf32, #tpu.memory_space<vmem>>, %arg7: memref<128x400xbf16, #tpu.memory_space<vmem>>, %arg8: memref<1x400xf32, #tpu.memory_space<vmem>>, %arg9: memref<400x896xbf16, #tpu.memory_space<vmem>>, %arg10: memref<1x896xf32, #tpu.memory_space<vmem>>, %arg11: memref<8x896xf32, #tpu.memory_space<vmem>>, %arg12: memref<8x128xf32, #tpu.memory_space<vmem>>) attributes {dimension_semantics = [#tpu.dimension_semantics<parallel>], iteration_bounds = array<i64: 1>, scalar_prefetch = 0 : i64, scratch_operands = 0 : i64, tpu.core_type = #tpu.core_type<tc>, window_params = [{transform_indices = @transform_0, window_bounds = array<i64: 8, 784>}, {transform_indices = @transform_1, window_bounds = array<i64: 8, 128>}, {pipeline_mode = #tpu.pipeline_mode<synchronous>, transform_indices = @transform_2, window_bounds = array<i64: 784, 400>}, {pipeline_mode = #tpu.pipeline_mode<synchronous>, transform_indices = @transform_3, window_bounds = array<i64: 1, 400>}, {pipeline_mode = #tpu.pipeline_mode<synchronous>, transform_indices = @transform_4, window_bounds = array<i64: 400, 128>}, {pipeline_mode = #tpu.pipeline_mode<synchronous>, transform_indices = @transform_5, window_bounds = array<i64: 1, 128>}, {pipeline_mode = #tpu.pipeline_mode<synchronous>, transform_indices = @transform_6, window_bounds = array<i64: 128, 400>}, {pipeline_mode = #tpu.pipeline_mode<synchronous>, transform_indices = @transform_7, window_bounds = array<i64: 1, 400>}, {pipeline_mode = #tpu.pipeline_mode<synchronous>, transform_indices = @transform_8, window_bounds = array<i64: 400, 896>}, {pipeline_mode = #tpu.pipeline_mode<synchronous>, transform_indices = @transform_9, window_bounds = array<i64: 1, 896>}, {transform_indices = @transform_10, window_bounds = array<i64: 8, 896>}, {transform_indices = @transform_11, window_bounds = array<i64: 8, 128>}]} {
    %c0 = arith.constant 0 : index
    %c0_0 = arith.constant 0 : index
    %0 = vector.load %arg1[%c0, %c0_0] : memref<8x784xbf16, #tpu.memory_space<vmem>>, vector<8x784xbf16>
    %c0_1 = arith.constant 0 : index
    %c0_2 = arith.constant 0 : index
    %1 = vector.load %arg3[%c0_1, %c0_2] : memref<784x400xbf16, #tpu.memory_space<vmem>>, vector<784x400xbf16>
    %cst = arith.constant dense<0.000000e+00> : vector<8x400xf32>
    %2 = tpu.matmul %0, %1, %cst {dimension_numbers = #tpu.dot_dimension_numbers<[1], [0], [0], [1], [0, 0, 1, 1], [], []>} : vector<8x784xbf16>, vector<784x400xbf16>, vector<8x400xf32> -> vector<8x400xf32>
    %c0_3 = arith.constant 0 : index
    %c0_4 = arith.constant 0 : index
    %3 = vector.load %arg4[%c0_3, %c0_4] : memref<1x400xf32, #tpu.memory_space<vmem>>, vector<1x400xf32>
    %4 = vector.broadcast %3 : vector<1x400xf32> to vector<8x400xf32>
    %5 = arith.addf %2, %4 : vector<8x400xf32>
    %cst_5 = arith.constant 0.000000e+00 : f32
    %6 = vector.broadcast %cst_5 : f32 to vector<8x400xf32>
    %7 = arith.maximumf %5, %6 : vector<8x400xf32>
    %8 = arith.truncf %7 : vector<8x400xf32> to vector<8x400xbf16>
    %c0_6 = arith.constant 0 : index
    %c0_7 = arith.constant 0 : index
    %9 = vector.load %arg5[%c0_6, %c0_7] : memref<400x128xbf16, #tpu.memory_space<vmem>>, vector<400x128xbf16>
    %cst_8 = arith.constant dense<0.000000e+00> : vector<8x128xf32>
    %10 = tpu.matmul %8, %9, %cst_8 {dimension_numbers = #tpu.dot_dimension_numbers<[1], [0], [0], [1], [0, 0, 1, 1], [], []>} : vector<8x400xbf16>, vector<400x128xbf16>, vector<8x128xf32> -> vector<8x128xf32>
    %c0_9 = arith.constant 0 : index
    %c0_10 = arith.constant 0 : index
    %11 = vector.load %arg6[%c0_9, %c0_10] : memref<1x128xf32, #tpu.memory_space<vmem>>, vector<1x128xf32>
    %12 = vector.broadcast %11 : vector<1x128xf32> to vector<8x128xf32>
    %13 = arith.addf %10, %12 : vector<8x128xf32>
    %c0_11 = arith.constant 0 : index
    %c0_12 = arith.constant 0 : index
    %14 = vector.load %arg12[%c0_11, %c0_12] : memref<8x128xf32, #tpu.memory_space<vmem>>, vector<8x128xf32>
    tpu.vector_store %arg12[%c0_11, %c0_12], %13 {strides = array<i32>} : memref<8x128xf32, #tpu.memory_space<vmem>>, vector<8x128xf32>,
    %c108_i32 = arith.constant 108 : i32
    %15 = tpu.dynamic_rotate %13 by %c108_i32 dim 1 : vector<8x128xf32>, i32 -> vector<8x128xf32>
    %cst_13 = arith.constant 5.000000e-01 : f32
    %16 = vector.broadcast %cst_13 : f32 to vector<8x128xf32>
    %17 = arith.mulf %16, %15 : vector<8x128xf32>
    %18 = math.exp %17 : vector<8x128xf32>
    %c0_14 = arith.constant 0 : index
    %c0_15 = arith.constant 0 : index
    %19 = vector.load %arg2[%c0_14, %c0_15] : memref<8x128xf32, #tpu.memory_space<vmem>>, vector<8x128xf32>
    %20 = arith.mulf %19, %18 : vector<8x128xf32>
    %21 = arith.addf %13, %20 : vector<8x128xf32>
    %22 = arith.truncf %21 : vector<8x128xf32> to vector<8x128xbf16>
    %c0_16 = arith.constant 0 : index
    %c0_17 = arith.constant 0 : index
    %23 = vector.load %arg7[%c0_16, %c0_17] : memref<128x400xbf16, #tpu.memory_space<vmem>>, vector<128x400xbf16>
    %cst_18 = arith.constant dense<0.000000e+00> : vector<8x400xf32>
    %24 = tpu.matmul %22, %23, %cst_18 {dimension_numbers = #tpu.dot_dimension_numbers<[1], [0], [0], [1], [0, 0, 1, 1], [], []>} : vector<8x128xbf16>, vector<128x400xbf16>, vector<8x400xf32> -> vector<8x400xf32>
    %c0_19 = arith.constant 0 : index
    %c0_20 = arith.constant 0 : index
    %25 = vector.load %arg8[%c0_19, %c0_20] : memref<1x400xf32, #tpu.memory_space<vmem>>, vector<1x400xf32>
    %26 = vector.broadcast %25 : vector<1x400xf32> to vector<8x400xf32>
    %27 = arith.addf %24, %26 : vector<8x400xf32>
    %cst_21 = arith.constant 0.000000e+00 : f32
    %28 = vector.broadcast %cst_21 : f32 to vector<8x400xf32>
    %29 = arith.maximumf %27, %28 : vector<8x400xf32>
    %30 = arith.truncf %29 : vector<8x400xf32> to vector<8x400xbf16>
    %c0_22 = arith.constant 0 : index
    %c0_23 = arith.constant 0 : index
    %31 = vector.load %arg9[%c0_22, %c0_23] : memref<400x896xbf16, #tpu.memory_space<vmem>>, vector<400x896xbf16>
    %cst_24 = arith.constant dense<0.000000e+00> : vector<8x896xf32>
    %32 = tpu.matmul %30, %31, %cst_24 {dimension_numbers = #tpu.dot_dimension_numbers<[1], [0], [0], [1], [0, 0, 1, 1], [], []>} : vector<8x400xbf16>, vector<400x896xbf16>, vector<8x896xf32> -> vector<8x896xf32>
    %c0_25 = arith.constant 0 : index
    %c0_26 = arith.constant 0 : index
    %33 = vector.load %arg10[%c0_25, %c0_26] : memref<1x896xf32, #tpu.memory_space<vmem>>, vector<1x896xf32>
    %34 = vector.broadcast %33 : vector<1x896xf32> to vector<8x896xf32>
    %35 = arith.addf %32, %34 : vector<8x896xf32>
    %36 = arith.negf %35 : vector<8x896xf32>
    %37 = math.exp %36 : vector<8x896xf32>
    %cst_27 = arith.constant 1.000000e+00 : f32
    %38 = vector.broadcast %cst_27 : f32 to vector<8x896xf32>
    %39 = arith.addf %38, %37 : vector<8x896xf32>
    %40 = arith.divf %38, %39 : vector<8x896xf32>
    %c0_28 = arith.constant 0 : index
    %c0_29 = arith.constant 0 : index
    %41 = vector.load %arg11[%c0_28, %c0_29] : memref<8x896xf32, #tpu.memory_space<vmem>>, vector<8x896xf32>
    tpu.vector_store %arg11[%c0_28, %c0_29], %40 {strides = array<i32>} : memref<8x896xf32, #tpu.memory_space<vmem>>, vector<8x896xf32>,
    return
  }
  func.func @transform_0(%arg0: i32) -> (i32, i32) {
    %c0_i32 = arith.constant 0 : i32
    %c0_i32_0 = arith.constant 0 : i32
    return %arg0, %c0_i32 : i32, i32
  }
  func.func @transform_1(%arg0: i32) -> (i32, i32) {
    %c0_i32 = arith.constant 0 : i32
    %c0_i32_0 = arith.constant 0 : i32
    return %arg0, %c0_i32 : i32, i32
  }
  func.func @transform_2(%arg0: i32) -> (i32, i32) {
    %c0_i32 = arith.constant 0 : i32
    %c0_i32_0 = arith.constant 0 : i32
    %c0_i32_1 = arith.constant 0 : i32
    return %c0_i32, %c0_i32_0 : i32, i32
  }
  func.func @transform_3(%arg0: i32) -> (i32, i32) {
    %c0_i32 = arith.constant 0 : i32
    %c0_i32_0 = arith.constant 0 : i32
    %c0_i32_1 = arith.constant 0 : i32
    return %c0_i32, %c0_i32_0 : i32, i32
  }
  func.func @transform_4(%arg0: i32) -> (i32, i32) {
    %c0_i32 = arith.constant 0 : i32
    %c0_i32_0 = arith.constant 0 : i32
    %c0_i32_1 = arith.constant 0 : i32
    return %c0_i32, %c0_i32_0 : i32, i32
  }
  func.func @transform_5(%arg0: i32) -> (i32, i32) {
    %c0_i32 = arith.constant 0 : i32
    %c0_i32_0 = arith.constant 0 : i32
    %c0_i32_1 = arith.constant 0 : i32
    return %c0_i32, %c0_i32_0 : i32, i32
  }
  func.func @transform_6(%arg0: i32) -> (i32, i32) {
    %c0_i32 = arith.constant 0 : i32
    %c0_i32_0 = arith.constant 0 : i32
    %c0_i32_1 = arith.constant 0 : i32
    return %c0_i32, %c0_i32_0 : i32, i32
  }
  func.func @transform_7(%arg0: i32) -> (i32, i32) {
    %c0_i32 = arith.constant 0 : i32
    %c0_i32_0 = arith.constant 0 : i32
    %c0_i32_1 = arith.constant 0 : i32
    return %c0_i32, %c0_i32_0 : i32, i32
  }
  func.func @transform_8(%arg0: i32) -> (i32, i32) {
    %c0_i32 = arith.constant 0 : i32
    %c0_i32_0 = arith.constant 0 : i32
    %c0_i32_1 = arith.constant 0 : i32
    return %c0_i32, %c0_i32_0 : i32, i32
  }
  func.func @transform_9(%arg0: i32) -> (i32, i32) {
    %c0_i32 = arith.constant 0 : i32
    %c0_i32_0 = arith.constant 0 : i32
    %c0_i32_1 = arith.constant 0 : i32
    return %c0_i32, %c0_i32_0 : i32, i32
  }
  func.func @transform_10(%arg0: i32) -> (i32, i32) {
    %c0_i32 = arith.constant 0 : i32
    %c0_i32_0 = arith.constant 0 : i32
    return %arg0, %c0_i32 : i32, i32
  }
  func.func @transform_11(%arg0: i32) -> (i32, i32) {
    %c0_i32 = arith.constant 0 : i32
    %c0_i32_0 = arith.constant 0 : i32
    return %arg0, %c0_i32 : i32, i32
  }
}

</mosaic_0001>

<bundles_post_ra>
// kernel: vae_forward.1
= control target key start
LH: loop header
LB: loop body
LE: loop exit
PB: predicated region body
PF: predicated region fallthrough
CT: control target
= control target key end

     0   :  { %v4962_v2 = vmov 0   ;;  %vm1265_vm0 = vcmask 130048   ;;  %s6466_s0 = inlined_call_operand.vmem [shape: bf16[8,784], index: 0, kind: input, shape index: {}]   ;;  %s6467_s1 = inlined_call_operand.vmem [shape: f32[8,128], index: 1, kind: input, shape index: {}]   ;;  %s6468_s2 = inlined_call_operand.vmem [shape: bf16[784,400], index: 2, kind: input, shape index: {}]   ;;  %s6469_s3 = inlined_call_operand.vmem [shape: f32[1,400], index: 3, kind: input, shape index: {}]   ;;  %s6470_s4 = inlined_call_operand.vmem [shape: bf16[400,128], index: 4, kind: input, shape index: {}]   ;;  %s6471_s5 = inlined_call_operand.vmem [shape: f32[1,128], index: 5, kind: input, shape index: {}]   ;;  %s6472_s6 = inlined_call_operand.vmem [shape: bf16[128,400], index: 6, kind: input, shape index: {}]   ;;  %s6473_s7 = inlined_call_operand.vmem [shape: f32[1,400], index: 7, kind: input, shape index: {}]   ;;  %s6474_s8 = inlined_call_operand.vmem [shape: bf16[400,896], index: 8, kind: input, shape index: {}]   ;;  %s6475_s9 = inlined_call_operand.vmem [shape: f32[1,896], index: 9, kind: input, shape index: {}]   ;;  %s6476_s10 = inlined_call_operand.hbm [shape: f32[8,896], index: 10, kind: output, shape index: {0}]   ;;  %s6477_s11 = inlined_call_operand.vmem [shape: f32[8,128], index: 11, kind: output, shape index: {1}]  }
   0x1   :  { %v4283_v0 = vld [vmem:[%s6468_s2 + $0x4] ss:$16 sps:$4 sm:$0xff]   ;;  %1424 = vmatprep.mubr.bf16.mxu1 %v4962_v2  ;;  %v4287_v3 = vld [vmem:[%s6468_s2] ss:$16 sps:$4 sm:$0xff]   ;;  %v4291_v6 = vld [vmem:[%s6466_s0 + $0x18] ss:$0 sps:$4 sm:$0xff]  }
   0x2   :  { %v4285_v1 = vld [vmem:[%s6468_s2 + $0x604] ss:$16 sps:$4 sm:$0xff]   ;;  %1269 = vmatprep.subr.bf16.mxu0 %v4283_v0  ;;  %v4288_v4 = vld [vmem:[%s6468_s2 + $0x600] ss:$16 sps:$4 sm:$0xff]   ;;  %v4292_v7 = vld [vmem:[%s6468_s2 + $0x8] ss:$16 sps:$4 sm:$0xff]  }
   0x3   :  { %1392 = vmatprep.subr.bf16.mxu1 %v4285_v1  ;;  %v4289_v5 = vld [vmem:[%s6468_s2 + $0x24] ss:$16 sps:$4 sm:$0xff]   ;;  %1270 = vmatpush1.bf16.msra.mxu0 %v4287_v3  ;;  %v4294_v8 = vld [vmem:[%s6468_s2 + $0xc] ss:$16 sps:$4 sm:$0xff]   ;;  %v4295_v9 = vld [vmem:[%s6468_s2 + $0x20] ss:$16 sps:$4 sm:$0xff]  }
   0x4   :  { %1393 = vmatpush1.bf16.msra.mxu1 %v4288_v4  ;;  %1271 = vmatprep.subr.bf16.mxu0 %v4289_v5  ;;  %v4296_v10 = vld [vmem:[%s6468_s2 + $0x44] ss:$16 sps:$4 sm:$0xff]   ;;  %v4298_v11 = vld [vmem:[%s6468_s2 + $0x28] ss:$16 sps:$4 sm:$0xff]   ;;  %v4300_v12 = vld [vmem:[%s6468_s2 + $0x2c] ss:$16 sps:$4 sm:$0xff]  }
   0x5   :  { %1433 = vmatprep.subr.bf16.mxu1 %v4294_v8  ;;  %v4301_v13 = vld [vmem:[%s6468_s2 + $0x40] ss:$16 sps:$4 sm:$0xff]   ;;  %v4302_v14 = vld [vmem:[%s6468_s2 + $0x64] ss:$16 sps:$4 sm:$0xff]   ;;  %v4306_v15 = vld [vmem:[%s6468_s2 + $0x4c] ss:$16 sps:$4 sm:$0xff]  }
   0x6   :  { %v4304_v16 = vld [vmem:[%s6468_s2 + $0x48] ss:$16 sps:$4 sm:$0xff]   ;;  %v4307_v17 = vld [vmem:[%s6468_s2 + $0x60] ss:$16 sps:$4 sm:$0xff]   ;;  %v4308_v18 = vld [vmem:[%s6468_s2 + $0x84] ss:$16 sps:$4 sm:$0xff]  }
   0x7   :  { %3945 = vmatmul.mubr.msk.bf16.vlgmr.msra.gmra.mrb[0].mxu1 %vm1265_vm0, %v4291_v6  ;;  %1272 = vmatpush1.bf16.msra.mxu0 %v4295_v9  ;;  %v4312_v19 = vld [vmem:[%s6468_s2 + $0x6c] ss:$16 sps:$4 sm:$0xff]   ;;  %v4310_v20 = vld [vmem:[%s6468_s2 + $0x68] ss:$16 sps:$4 sm:$0xff]   ;;  %v4313_v21 = vld [vmem:[%s6468_s2 + $0x80] ss:$16 sps:$4 sm:$0xff]  }
   0x8   :  { %1434 = vmatpush1.bf16.msra.mxu1 %v4292_v7  ;;  %1273 = vmatprep.subr.bf16.mxu0 %v4296_v10  ;;  %v4314_v22 = vld [vmem:[%s6468_s2 + $0xa4] ss:$16 sps:$4 sm:$0xff]   ;;  %v4318_v23 = vld [vmem:[%s6468_s2 + $0x8c] ss:$16 sps:$4 sm:$0xff]   ;;  %v4316_v24 = vld [vmem:[%s6468_s2 + $0x88] ss:$16 sps:$4 sm:$0xff]  }
   0x9   :  { %1435 = vmatprep.subr.bf16.mxu1 %v4300_v12  ;;  %v4319_v25 = vld [vmem:[%s6468_s2 + $0xa0] ss:$16 sps:$4 sm:$0xff]   ;;  %v4320_v26 = vld [vmem:[%s6468_s2 + $0xc4] ss:$16 sps:$4 sm:$0xff]   ;;  %v4324_v27 = vld [vmem:[%s6468_s2 + $0xac] ss:$16 sps:$4 sm:$0xff]  }
   0xa   :  { %v4322_v28 = vld [vmem:[%s6468_s2 + $0xa8] ss:$16 sps:$4 sm:$0xff]   ;;  %v4325_v29 = vld [vmem:[%s6468_s2 + $0xc0] ss:$16 sps:$4 sm:$0xff]   ;;  %v4326_v30 = vld [vmem:[%s6468_s2 + $0xe4] ss:$16 sps:$4 sm:$0xff]  }
   0xb   :  { %1274 = vmatpush1.bf16.msra.mxu0 %v4301_v13  ;;  %v4330_v31 = vld [vmem:[%s6468_s2 + $0xcc] ss:$16 sps:$4 sm:$0xff]   ;;  %v4328_v32 = vld [vmem:[%s6468_s2 + $0xc8] ss:$16 sps:$4 sm:$0xff]   ;;  %v4331_v33 = vld [vmem:[%s6468_s2 + $0xe0] ss:$16 sps:$4 sm:$0xff]  }
   0xc   :  { %1436 = vmatpush1.bf16.msra.mxu1 %v4298_v11  ;;  %1275 = vmatprep.subr.bf16.mxu0 %v4302_v14  ;;  %v4332_v34 = vld [vmem:[%s6468_s2 + $0x104] ss:$16 sps:$4 sm:$0xff]   ;;  %v4336_v35 = vld [vmem:[%s6468_s2 + $0xec] ss:$16 sps:$4 sm:$0xff]   ;;  %v4334_v36 = vld [vmem:[%s6468_s2 + $0xe8] ss:$16 sps:$4 sm:$0xff]  }
   0xd   :  { %1437 = vmatprep.subr.bf16.mxu1 %v4306_v15  ;;  %v4337_v37 = vld [vmem:[%s6468_s2 + $0x100] ss:$16 sps:$4 sm:$0xff]   ;;  %v4338_v38 = vld [vmem:[%s6468_s2 + $0x124] ss:$16 sps:$4 sm:$0xff]   ;;  %v4342_v39 = vld [vmem:[%s6468_s2 + $0x10c] ss:$16 sps:$4 sm:$0xff]  }
   0xe   :  { %v4340_v40 = vld [vmem:[%s6468_s2 + $0x108] ss:$16 sps:$4 sm:$0xff]   ;;  %v4343_v41 = vld [vmem:[%s6468_s2 + $0x120] ss:$16 sps:$4 sm:$0xff]   ;;  %v4344_v42 = vld [vmem:[%s6468_s2 + $0x144] ss:$16 sps:$4 sm:$0xff]  }
   0xf   :  { %1276 = vmatpush1.bf16.msra.mxu0 %v4307_v17  ;;  %v4348_v43 = vld [vmem:[%s6468_s2 + $0x12c] ss:$16 sps:$4 sm:$0xff]   ;;  %v4346_v44 = vld [vmem:[%s6468_s2 + $0x128] ss:$16 sps:$4 sm:$0xff]   ;;  %v4349_v45 = vld [vmem:[%s6468_s2 + $0x140] ss:$16 sps:$4 sm:$0xff]  }
  0x10   :  { %1438 = vmatpush1.bf16.msra.mxu1 %v4304_v16  ;;  %1277 = vmatprep.subr.bf16.mxu0 %v4308_v18  ;;  %v4350_v46 = vld [vmem:[%s6468_s2 + $0x164] ss:$16 sps:$4 sm:$0xff]   ;;  %v4354_v47 = vld [vmem:[%s6468_s2 + $0x14c] ss:$16 sps:$4 sm:$0xff]   ;;  %v4352_v48 = vld [vmem:[%s6468_s2 + $0x148] ss:$16 sps:$4 sm:$0xff]  }
  0x11   :  { %1439 = vmatprep.subr.bf16.mxu1 %v4312_v19  ;;  %v39_v49 = vld [vmem:[%s6466_s0] sm:$0xff]  ;;  %v4360_v53 = vld [vmem:[%s6468_s2 + $0x16c] ss:$16 sps:$4 sm:$0xff]   ;;  %v4358_v54 = vld [vmem:[%s6468_s2 + $0x168] ss:$16 sps:$4 sm:$0xff]  }
  0x12   :  { %v4355_v50 = vld [vmem:[%s6468_s2 + $0x160] ss:$16 sps:$4 sm:$0xff]   ;;  %v4356_v51 = vld [vmem:[%s6468_s2 + $0x184] ss:$16 sps:$4 sm:$0xff]   ;;  %v3743_v52 = vcombine.high %v39_v49, %v39_v49  ;;  %v4366_v57 = vld [vmem:[%s6468_s2 + $0x18c] ss:$16 sps:$4 sm:$0xff]   ;;  %v3742_v7 = vcombine.low %v39_v49, %v39_v49 }
  0x13   :  { %1278 = vmatpush1.bf16.msra.mxu0 %v4313_v21  ;;  %v4361_v55 = vld [vmem:[%s6468_s2 + $0x180] ss:$16 sps:$4 sm:$0xff]   ;;  %v4362_v56 = vld [vmem:[%s6468_s2 + $0x1a4] ss:$16 sps:$4 sm:$0xff]   ;;  %v4364_v58 = vld [vmem:[%s6468_s2 + $0x188] ss:$16 sps:$4 sm:$0xff]  }
  0x14   :  { %1440 = vmatpush1.bf16.msra.mxu1 %v4310_v20  ;;  %1279 = vmatprep.subr.bf16.mxu0 %v4314_v22  ;;  %v4367_v59 = vld [vmem:[%s6468_s2 + $0x1a0] ss:$16 sps:$4 sm:$0xff]   ;;  %v4368_v60 = vld [vmem:[%s6468_s2 + $0x1c4] ss:$16 sps:$4 sm:$0xff]   ;;  %v4372_v61 = vld [vmem:[%s6468_s2 + $0x1ac] ss:$16 sps:$4 sm:$0xff]  }
  0x15   :  { %1441 = vmatprep.subr.bf16.mxu1 %v4318_v23  ;;  %1301 = vmatprep.mubr.bf16.mxu0 %v3743_v52  ;;  %v4370_v62 = vld [vmem:[%s6468_s2 + $0x1a8] ss:$16 sps:$4 sm:$0xff]   ;;  %v4373_v63 = vld [vmem:[%s6468_s2 + $0x1c0] ss:$16 sps:$4 sm:$0xff]   ;;  %v4374_v0 = vld [vmem:[%s6468_s2 + $0x1e4] ss:$16 sps:$4 sm:$0xff]  }
  0x16   :  { %1465 = vmatprep.mubr.bf16.mxu1 %v3743_v52  ;;  %v4378_v1 = vld [vmem:[%s6468_s2 + $0x1cc] ss:$16 sps:$4 sm:$0xff]   ;;  %v4376_v3 = vld [vmem:[%s6468_s2 + $0x1c8] ss:$16 sps:$4 sm:$0xff]   ;;  %v4379_v4 = vld [vmem:[%s6468_s2 + $0x1e0] ss:$16 sps:$4 sm:$0xff]  }
  0x17   :  { %1280 = vmatpush1.bf16.msra.mxu0 %v4319_v25  ;;  %v4384_v5 = vld [vmem:[%s6468_s2 + $0x204] ss:$16 sps:$4 sm:$0xff]   ;;  %v4387_v6 = vld [vmem:[%s6468_s2 + $0x1ec] ss:$16 sps:$4 sm:$0xff]   ;;  %v4382_v8 = vld [vmem:[%s6468_s2 + $0x200] ss:$16 sps:$4 sm:$0xff]  }
  0x18   :  { %1442 = vmatpush1.bf16.msra.mxu1 %v4316_v24  ;;  %1281 = vmatprep.subr.bf16.mxu0 %v4320_v26  ;;  %v4385_v9 = vld [vmem:[%s6468_s2 + $0x1e8] ss:$16 sps:$4 sm:$0xff]   ;;  %v4390_v10 = vld [vmem:[%s6468_s2 + $0x224] ss:$16 sps:$4 sm:$0xff]   ;;  %v4393_v11 = vld [vmem:[%s6468_s2 + $0x20c] ss:$16 sps:$4 sm:$0xff]  }
  0x19   :  { %1443 = vmatprep.subr.bf16.mxu1 %v4324_v27  ;;  %v4388_v12 = vld [vmem:[%s6468_s2 + $0x220] ss:$16 sps:$4 sm:$0xff]   ;;  %v4391_v13 = vld [vmem:[%s6468_s2 + $0x208] ss:$16 sps:$4 sm:$0xff]   ;;  %v4396_v14 = vld [vmem:[%s6468_s2 + $0x244] ss:$16 sps:$4 sm:$0xff]  }
  0x1a   :  { %v4399_v15 = vld [vmem:[%s6468_s2 + $0x22c] ss:$16 sps:$4 sm:$0xff]   ;;  %v4394_v16 = vld [vmem:[%s6468_s2 + $0x240] ss:$16 sps:$4 sm:$0xff]   ;;  %v4397_v17 = vld [vmem:[%s6468_s2 + $0x228] ss:$16 sps:$4 sm:$0xff]  }
  0x1b   :  { %1282 = vmatpush1.bf16.msra.mxu0 %v4325_v29  ;;  %v4402_v18 = vld [vmem:[%s6468_s2 + $0x264] ss:$16 sps:$4 sm:$0xff]   ;;  %v4405_v19 = vld [vmem:[%s6468_s2 + $0x24c] ss:$16 sps:$4 sm:$0xff]   ;;  %v4400_v20 = vld [vmem:[%s6468_s2 + $0x260] ss:$16 sps:$4 sm:$0xff]  }
  0x1c   :  { %1444 = vmatpush1.bf16.msra.mxu1 %v4322_v28  ;;  %1283 = vmatprep.subr.bf16.mxu0 %v4326_v30  ;;  %v4403_v21 = vld [vmem:[%s6468_s2 + $0x248] ss:$16 sps:$4 sm:$0xff]   ;;  %v4408_v22 = vld [vmem:[%s6468_s2 + $0x284] ss:$16 sps:$4 sm:$0xff]   ;;  %v4411_v23 = vld [vmem:[%s6468_s2 + $0x26c] ss:$16 sps:$4 sm:$0xff]  }
  0x1d   :  { %1445 = vmatprep.subr.bf16.mxu1 %v4330_v31  ;;  %v4406_v24 = vld [vmem:[%s6468_s2 + $0x280] ss:$16 sps:$4 sm:$0xff]   ;;  %v4409_v25 = vld [vmem:[%s6468_s2 + $0x268] ss:$16 sps:$4 sm:$0xff]   ;;  %v4414_v26 = vld [vmem:[%s6468_s2 + $0x2a4] ss:$16 sps:$4 sm:$0xff]  }
  0x1e   :  { %v4417_v27 = vld [vmem:[%s6468_s2 + $0x28c] ss:$16 sps:$4 sm:$0xff]   ;;  %v4412_v28 = vld [vmem:[%s6468_s2 + $0x2a0] ss:$16 sps:$4 sm:$0xff]   ;;  %v4415_v29 = vld [vmem:[%s6468_s2 + $0x288] ss:$16 sps:$4 sm:$0xff]  }
  0x1f   :  { %1284 = vmatpush1.bf16.msra.mxu0 %v4331_v33  ;;  %v4420_v30 = vld [vmem:[%s6468_s2 + $0x2c4] ss:$16 sps:$4 sm:$0xff]   ;;  %v4423_v31 = vld [vmem:[%s6468_s2 + $0x2ac] ss:$16 sps:$4 sm:$0xff]   ;;  %v4418_v33 = vld [vmem:[%s6468_s2 + $0x2c0] ss:$16 sps:$4 sm:$0xff]  }
  0x20   :  { %1446 = vmatpush1.bf16.msra.mxu1 %v4328_v32  ;;  %1285 = vmatprep.subr.bf16.mxu0 %v4332_v34  ;;  %v5306_v32 = vld [vmem:[%s6466_s0 + $0x8] sm:$0xff]  ;;  %v4450_v52 = vld [vmem:[%s6468_s2 + $0x364] ss:$16 sps:$4 sm:$0xff]  }
  0x21   :  { %1447 = vmatprep.subr.bf16.mxu1 %v4336_v35  ;;  %v4421_v34 = vld [vmem:[%s6468_s2 + $0x2a8] ss:$16 sps:$4 sm:$0xff]   ;;  %v3745_v35 = vcombine.high %v5306_v32, %v5306_v32  ;;  %v4447_v49 = vld [vmem:[%s6468_s2 + $0x32c] ss:$16 sps:$4 sm:$0xff]  }
  0x23   :  { %1286 = vmatpush1.bf16.msra.mxu0 %v4337_v37  ;;  %v4429_v37 = vld [vmem:[%s6468_s2 + $0x2cc] ss:$16 sps:$4 sm:$0xff]  }
  0x24   :  { %1448 = vmatpush1.bf16.msra.mxu1 %v4334_v36  ;;  %1287 = vmatprep.subr.bf16.mxu0 %v4338_v38  ;;  %v4426_v36 = vld [vmem:[%s6468_s2 + $0x2e4] ss:$16 sps:$4 sm:$0xff]   ;;  %v4424_v38 = vld [vmem:[%s6468_s2 + $0x2e0] ss:$16 sps:$4 sm:$0xff]  }
  0x25   :  { %1449 = vmatprep.subr.bf16.mxu1 %v4342_v39  ;;  %v4427_v39 = vld [vmem:[%s6468_s2 + $0x2c8] ss:$16 sps:$4 sm:$0xff]  }
  0x27   :  { %1288 = vmatpush1.bf16.msra.mxu0 %v4343_v41  ;;  %v4435_v41 = vld [vmem:[%s6468_s2 + $0x2ec] ss:$16 sps:$4 sm:$0xff]  }
  0x28   :  { %1450 = vmatpush1.bf16.msra.mxu1 %v4340_v40  ;;  %1289 = vmatprep.subr.bf16.mxu0 %v4344_v42  ;;  %v4432_v40 = vld [vmem:[%s6468_s2 + $0x304] ss:$16 sps:$4 sm:$0xff]   ;;  %v4430_v42 = vld [vmem:[%s6468_s2 + $0x300] ss:$16 sps:$4 sm:$0xff]  }
  0x29   :  { %1451 = vmatprep.subr.bf16.mxu1 %v4348_v43  ;;  %v4433_v43 = vld [vmem:[%s6468_s2 + $0x2e8] ss:$16 sps:$4 sm:$0xff]  }
  0x2b   :  { %1290 = vmatpush1.bf16.msra.mxu0 %v4349_v45  ;;  %v4441_v45 = vld [vmem:[%s6468_s2 + $0x30c] ss:$16 sps:$4 sm:$0xff]  }
  0x2c   :  { %1452 = vmatpush1.bf16.msra.mxu1 %v4346_v44  ;;  %1291 = vmatprep.subr.bf16.mxu0 %v4350_v46  ;;  %v4438_v44 = vld [vmem:[%s6468_s2 + $0x324] ss:$16 sps:$4 sm:$0xff]   ;;  %v4436_v46 = vld [vmem:[%s6468_s2 + $0x320] ss:$16 sps:$4 sm:$0xff]  }
  0x2d   :  { %1453 = vmatprep.subr.bf16.mxu1 %v4354_v47  ;;  %v4439_v47 = vld [vmem:[%s6468_s2 + $0x308] ss:$16 sps:$4 sm:$0xff]  }
  0x2f   :  { %1292 = vmatpush1.bf16.msra.mxu0 %v4355_v50  ;;  %v4442_v50 = vld [vmem:[%s6468_s2 + $0x340] ss:$16 sps:$4 sm:$0xff]  }
  0x30   :  { %1454 = vmatpush1.bf16.msra.mxu1 %v4352_v48  ;;  %1293 = vmatprep.subr.bf16.mxu0 %v4356_v51  ;;  %v4444_v48 = vld [vmem:[%s6468_s2 + $0x344] ss:$16 sps:$4 sm:$0xff]   ;;  %v4445_v51 = vld [vmem:[%s6468_s2 + $0x328] ss:$16 sps:$4 sm:$0xff]  }
  0x31   :  { %1455 = vmatprep.subr.bf16.mxu1 %v4360_v53  ;;  %v4453_v53 = vld [vmem:[%s6468_s2 + $0x34c] ss:$16 sps:$4 sm:$0xff]  }
  0x33   :  { %1294 = vmatpush1.bf16.msra.mxu0 %v4361_v55  ;;  %v4451_v55 = vld [vmem:[%s6468_s2 + $0x348] ss:$16 sps:$4 sm:$0xff]  }
  0x34   :  { %1456 = vmatpush1.bf16.msra.mxu1 %v4358_v54  ;;  %1295 = vmatprep.subr.bf16.mxu0 %v4362_v56  ;;  %v4448_v54 = vld [vmem:[%s6468_s2 + $0x360] ss:$16 sps:$4 sm:$0xff]   ;;  %v4456_v56 = vld [vmem:[%s6468_s2 + $0x384] ss:$16 sps:$4 sm:$0xff]  }
  0x35   :  { %1457 = vmatprep.subr.bf16.mxu1 %v4366_v57  ;;  %v4459_v57 = vld [vmem:[%s6468_s2 + $0x36c] ss:$16 sps:$4 sm:$0xff]  }
  0x37   :  { %1296 = vmatpush1.bf16.msra.mxu0 %v4367_v59  ;;  %v4457_v59 = vld [vmem:[%s6468_s2 + $0x368] ss:$16 sps:$4 sm:$0xff]  }
  0x38   :  { %1458 = vmatpush1.bf16.msra.mxu1 %v4364_v58  ;;  %1297 = vmatprep.subr.bf16.mxu0 %v4368_v60  ;;  %v4454_v58 = vld [vmem:[%s6468_s2 + $0x380] ss:$16 sps:$4 sm:$0xff]   ;;  %v4462_v60 = vld [vmem:[%s6468_s2 + $0x3a4] ss:$16 sps:$4 sm:$0xff]  }
  0x39   :  { %1459 = vmatprep.subr.bf16.mxu1 %v4372_v61  ;;  %v4465_v61 = vld [vmem:[%s6468_s2 + $0x38c] ss:$16 sps:$4 sm:$0xff]  }
  0x3b   :  { %1298 = vmatpush1.bf16.msra.mxu0 %v4373_v63  ;;  %v4463_v63 = vld [vmem:[%s6468_s2 + $0x388] ss:$16 sps:$4 sm:$0xff]  }
  0x3c   :  { %1460 = vmatpush1.bf16.msra.mxu1 %v4370_v62  ;;  %1299 = vmatprep.subr.bf16.mxu0 %v4374_v0  ;;  %v4460_v62 = vld [vmem:[%s6468_s2 + $0x3a0] ss:$16 sps:$4 sm:$0xff]   ;;  %v4468_v0 = vld [vmem:[%s6468_s2 + $0x3c4] ss:$16 sps:$4 sm:$0xff]  }
  0x3d   :  { %1461 = vmatprep.subr.bf16.mxu1 %v4378_v1  ;;  %v4471_v1 = vld [vmem:[%s6468_s2 + $0x3ac] ss:$16 sps:$4 sm:$0xff]  }
  0x3f   :  { %1300 = vmatpush1.bf16.msra.mxu0 %v4379_v4  ;;  %v4469_v4 = vld [vmem:[%s6468_s2 + $0x3a8] ss:$16 sps:$4 sm:$0xff]  }
  0x40   :  { %1462 = vmatpush1.bf16.msra.mxu1 %v4376_v3  ;;  %1310 = vmatprep.subr.bf16.mxu0 %v4384_v5  ;;  %v4466_v3 = vld [vmem:[%s6468_s2 + $0x3c0] ss:$16 sps:$4 sm:$0xff]   ;;  %v4474_v5 = vld [vmem:[%s6468_s2 + $0x3e4] ss:$16 sps:$4 sm:$0xff]  }
  0x41   :  { %1463 = vmatprep.subr.bf16.mxu1 %v4387_v6  ;;  %v4477_v6 = vld [vmem:[%s6468_s2 + $0x3cc] ss:$16 sps:$4 sm:$0xff]  }
  0x42   :  { %1302 = vmatmul.mubr.bf16.vlgmr.msra.gmra.mrb[0].mxu0 %v3742_v7 }
  0x43   :  { %1311 = vmatpush1.bf16.msra.mxu0 %v4382_v8  ;;  %1342 = vmatprep.mubr.bf16.mxu0 %v3745_v35  ;;  %v4475_v8 = vld [vmem:[%s6468_s2 + $0x3c8] ss:$16 sps:$4 sm:$0xff]  }
  0x44   :  { %1464 = vmatpush1.bf16.msra.mxu1 %v4385_v9  ;;  %1312 = vmatprep.subr.bf16.mxu0 %v4390_v10  ;;  %v4482_v9 = vld [vmem:[%s6468_s2 + $0x404] ss:$16 sps:$4 sm:$0xff]   ;;  %v4485_v10 = vld [vmem:[%s6468_s2 + $0x3ec] ss:$16 sps:$4 sm:$0xff]  }
  0x45   :  { %1474 = vmatprep.subr.bf16.mxu1 %v4393_v11  ;;  %v3744_v11 = vcombine.low %v5306_v32, %v5306_v32  ;;  %v4512_v32 = vld [vmem:[%s6468_s2 + $0x4a4] ss:$16 sps:$4 sm:$0xff]  }
  0x47   :  { %1466 = vmatmul.mubr.bf16.vlgmr.msra.gmra.mrb[4].mxu1 %v3742_v7  ;;  %1313 = vmatpush1.bf16.msra.mxu0 %v4388_v12  ;;  %v4472_v7 = vld [vmem:[%s6468_s2 + $0x3e0] ss:$16 sps:$4 sm:$0xff]  }
  0x48   :  { %1475 = vmatpush1.bf16.msra.mxu1 %v4391_v13  ;;  %1314 = vmatprep.subr.bf16.mxu0 %v4396_v14  ;;  %v4480_v12 = vld [vmem:[%s6468_s2 + $0x400] ss:$16 sps:$4 sm:$0xff]   ;;  %v4483_v13 = vld [vmem:[%s6468_s2 + $0x3e8] ss:$16 sps:$4 sm:$0xff]   ;;  %v4488_v14 = vld [vmem:[%s6468_s2 + $0x424] ss:$16 sps:$4 sm:$0xff]  }
  0x49   :  { %1476 = vmatprep.subr.bf16.mxu1 %v4399_v15  ;;  %1506 = vmatprep.mubr.bf16.mxu1 %v3745_v35  ;;  %v4491_v15 = vld [vmem:[%s6468_s2 + $0x40c] ss:$16 sps:$4 sm:$0xff]   ;;  %v4513_v35 = vld [vmem:[%s6468_s2 + $0x488] ss:$16 sps:$4 sm:$0xff]  }
  0x4b   :  { %1315 = vmatpush1.bf16.msra.mxu0 %v4394_v16  ;;  %v5447_v16 = vld [vmem:[%s6466_s0 + $0x10] sm:$0xff] }
  0x4c   :  { %1477 = vmatpush1.bf16.msra.mxu1 %v4397_v17  ;;  %1316 = vmatprep.subr.bf16.mxu0 %v4402_v18  ;;  %v4486_v17 = vld [vmem:[%s6468_s2 + $0x420] ss:$16 sps:$4 sm:$0xff]   ;;  %v3747_v18 = vcombine.high %v5447_v16, %v5447_v16 }
  0x4d   :  { %1478 = vmatprep.subr.bf16.mxu1 %v4405_v19  ;;  %v4489_v19 = vld [vmem:[%s6468_s2 + $0x408] ss:$16 sps:$4 sm:$0xff]  }
  0x4f   :  { %1317 = vmatpush1.bf16.msra.mxu0 %v4400_v20  ;;  %v4494_v20 = vld [vmem:[%s6468_s2 + $0x444] ss:$16 sps:$4 sm:$0xff]  }
  0x50   :  { %1479 = vmatpush1.bf16.msra.mxu1 %v4403_v21  ;;  %1318 = vmatprep.subr.bf16.mxu0 %v4408_v22  ;;  %v4497_v21 = vld [vmem:[%s6468_s2 + $0x42c] ss:$16 sps:$4 sm:$0xff]   ;;  %v4492_v22 = vld [vmem:[%s6468_s2 + $0x440] ss:$16 sps:$4 sm:$0xff]  }
  0x51   :  { %1480 = vmatprep.subr.bf16.mxu1 %v4411_v23  ;;  %v4495_v23 = vld [vmem:[%s6468_s2 + $0x428] ss:$16 sps:$4 sm:$0xff]  }
  0x53   :  { %1319 = vmatpush1.bf16.msra.mxu0 %v4406_v24  ;;  %v4500_v24 = vld [vmem:[%s6468_s2 + $0x464] ss:$16 sps:$4 sm:$0xff]  }
  0x54   :  { %1481 = vmatpush1.bf16.msra.mxu1 %v4409_v25  ;;  %1320 = vmatprep.subr.bf16.mxu0 %v4414_v26  ;;  %v4503_v25 = vld [vmem:[%s6468_s2 + $0x44c] ss:$16 sps:$4 sm:$0xff]   ;;  %v4498_v26 = vld [vmem:[%s6468_s2 + $0x460] ss:$16 sps:$4 sm:$0xff]  }
  0x55   :  { %1482 = vmatprep.subr.bf16.mxu1 %v4417_v27  ;;  %v4501_v27 = vld [vmem:[%s6468_s2 + $0x448] ss:$16 sps:$4 sm:$0xff]  }
  0x57   :  { %1321 = vmatpush1.bf16.msra.mxu0 %v4412_v28  ;;  %v4506_v28 = vld [vmem:[%s6468_s2 + $0x484] ss:$16 sps:$4 sm:$0xff]  }
  0x58   :  { %1483 = vmatpush1.bf16.msra.mxu1 %v4415_v29  ;;  %1322 = vmatprep.subr.bf16.mxu0 %v4420_v30  ;;  %v4509_v29 = vld [vmem:[%s6468_s2 + $0x46c] ss:$16 sps:$4 sm:$0xff]   ;;  %v4504_v30 = vld [vmem:[%s6468_s2 + $0x480] ss:$16 sps:$4 sm:$0xff]  }
  0x59   :  { %1484 = vmatprep.subr.bf16.mxu1 %v4423_v31  ;;  %v4507_v31 = vld [vmem:[%s6468_s2 + $0x468] ss:$16 sps:$4 sm:$0xff]  }
  0x5b   :  { %1323 = vmatpush1.bf16.msra.mxu0 %v4418_v33  ;;  %v4515_v33 = vld [vmem:[%s6468_s2 + $0x48c] ss:$16 sps:$4 sm:$0xff]  }
  0x5c   :  { %1485 = vmatpush1.bf16.msra.mxu1 %v4421_v34  ;;  %1324 = vmatprep.subr.bf16.mxu0 %v4426_v36  ;;  %v4510_v34 = vld [vmem:[%s6468_s2 + $0x4a0] ss:$16 sps:$4 sm:$0xff]   ;;  %v4518_v36 = vld [vmem:[%s6468_s2 + $0x4c4] ss:$16 sps:$4 sm:$0xff]  }
  0x5d   :  { %1486 = vmatprep.subr.bf16.mxu1 %v4429_v37  ;;  %v4521_v37 = vld [vmem:[%s6468_s2 + $0x4ac] ss:$16 sps:$4 sm:$0xff]  }
  0x5f   :  { %1325 = vmatpush1.bf16.msra.mxu0 %v4424_v38  ;;  %v4516_v38 = vld [vmem:[%s6468_s2 + $0x4c0] ss:$16 sps:$4 sm:$0xff]  }
  0x60   :  { %1487 = vmatpush1.bf16.msra.mxu1 %v4427_v39  ;;  %1326 = vmatprep.subr.bf16.mxu0 %v4432_v40  ;;  %v4519_v39 = vld [vmem:[%s6468_s2 + $0x4a8] ss:$16 sps:$4 sm:$0xff]   ;;  %v4524_v40 = vld [vmem:[%s6468_s2 + $0x4e4] ss:$16 sps:$4 sm:$0xff]  }
  0x61   :  { %1488 = vmatprep.subr.bf16.mxu1 %v4435_v41  ;;  %v4527_v41 = vld [vmem:[%s6468_s2 + $0x4cc] ss:$16 sps:$4 sm:$0xff]  }
  0x63   :  { %1327 = vmatpush1.bf16.msra.mxu0 %v4430_v42  ;;  %v4522_v42 = vld [vmem:[%s6468_s2 + $0x4e0] ss:$16 sps:$4 sm:$0xff]  }
  0x64   :  { %1489 = vmatpush1.bf16.msra.mxu1 %v4433_v43  ;;  %1328 = vmatprep.subr.bf16.mxu0 %v4438_v44  ;;  %v4525_v43 = vld [vmem:[%s6468_s2 + $0x4c8] ss:$16 sps:$4 sm:$0xff]   ;;  %v4530_v44 = vld [vmem:[%s6468_s2 + $0x504] ss:$16 sps:$4 sm:$0xff]  }
  0x65   :  { %1490 = vmatprep.subr.bf16.mxu1 %v4441_v45  ;;  %v4533_v45 = vld [vmem:[%s6468_s2 + $0x4ec] ss:$16 sps:$4 sm:$0xff]  }
  0x67   :  { %1329 = vmatpush1.bf16.msra.mxu0 %v4436_v46  ;;  %v4528_v46 = vld [vmem:[%s6468_s2 + $0x500] ss:$16 sps:$4 sm:$0xff]  }
  0x68   :  { %1491 = vmatpush1.bf16.msra.mxu1 %v4439_v47  ;;  %1330 = vmatprep.subr.bf16.mxu0 %v4444_v48  ;;  %v4531_v47 = vld [vmem:[%s6468_s2 + $0x4e8] ss:$16 sps:$4 sm:$0xff]   ;;  %v4536_v48 = vld [vmem:[%s6468_s2 + $0x524] ss:$16 sps:$4 sm:$0xff]  }
  0x69   :  { %1492 = vmatprep.subr.bf16.mxu1 %v4447_v49  ;;  %v4539_v49 = vld [vmem:[%s6468_s2 + $0x50c] ss:$16 sps:$4 sm:$0xff]  }
  0x6b   :  { %1331 = vmatpush1.bf16.msra.mxu0 %v4442_v50  ;;  %v4534_v50 = vld [vmem:[%s6468_s2 + $0x520] ss:$16 sps:$4 sm:$0xff]  }
  0x6c   :  { %1493 = vmatpush1.bf16.msra.mxu1 %v4445_v51  ;;  %1332 = vmatprep.subr.bf16.mxu0 %v4450_v52  ;;  %v4537_v51 = vld [vmem:[%s6468_s2 + $0x508] ss:$16 sps:$4 sm:$0xff]   ;;  %v4542_v52 = vld [vmem:[%s6468_s2 + $0x544] ss:$16 sps:$4 sm:$0xff]  }
  0x6d   :  { %1494 = vmatprep.subr.bf16.mxu1 %v4453_v53  ;;  %v4545_v53 = vld [vmem:[%s6468_s2 + $0x52c] ss:$16 sps:$4 sm:$0xff]  }
  0x6f   :  { %1333 = vmatpush1.bf16.msra.mxu0 %v4448_v54  ;;  %v4540_v54 = vld [vmem:[%s6468_s2 + $0x540] ss:$16 sps:$4 sm:$0xff]  }
  0x70   :  { %1495 = vmatpush1.bf16.msra.mxu1 %v4451_v55  ;;  %1334 = vmatprep.subr.bf16.mxu0 %v4456_v56  ;;  %v4543_v55 = vld [vmem:[%s6468_s2 + $0x528] ss:$16 sps:$4 sm:$0xff]   ;;  %v4548_v56 = vld [vmem:[%s6468_s2 + $0x564] ss:$16 sps:$4 sm:$0xff]  }
  0x71   :  { %1496 = vmatprep.subr.bf16.mxu1 %v4459_v57  ;;  %v4551_v57 = vld [vmem:[%s6468_s2 + $0x54c] ss:$16 sps:$4 sm:$0xff]  }
  0x73   :  { %1335 = vmatpush1.bf16.msra.mxu0 %v4454_v58  ;;  %v4546_v58 = vld [vmem:[%s6468_s2 + $0x560] ss:$16 sps:$4 sm:$0xff]  }
  0x74   :  { %1497 = vmatpush1.bf16.msra.mxu1 %v4457_v59  ;;  %1336 = vmatprep.subr.bf16.mxu0 %v4462_v60  ;;  %v4549_v59 = vld [vmem:[%s6468_s2 + $0x548] ss:$16 sps:$4 sm:$0xff]   ;;  %v4554_v60 = vld [vmem:[%s6468_s2 + $0x584] ss:$16 sps:$4 sm:$0xff]  }
  0x75   :  { %1498 = vmatprep.subr.bf16.mxu1 %v4465_v61  ;;  %v4557_v61 = vld [vmem:[%s6468_s2 + $0x56c] ss:$16 sps:$4 sm:$0xff]  }
  0x77   :  { %1337 = vmatpush1.bf16.msra.mxu0 %v4460_v62  ;;  %v4552_v62 = vld [vmem:[%s6468_s2 + $0x580] ss:$16 sps:$4 sm:$0xff]  }
  0x78   :  { %1499 = vmatpush1.bf16.msra.mxu1 %v4463_v63  ;;  %1338 = vmatprep.subr.bf16.mxu0 %v4468_v0  ;;  %v4555_v63 = vld [vmem:[%s6468_s2 + $0x568] ss:$16 sps:$4 sm:$0xff]   ;;  %v4560_v0 = vld [vmem:[%s6468_s2 + $0x5a4] ss:$16 sps:$4 sm:$0xff]  }
  0x79   :  { %1500 = vmatprep.subr.bf16.mxu1 %v4471_v1  ;;  %v4563_v1 = vld [vmem:[%s6468_s2 + $0x58c] ss:$16 sps:$4 sm:$0xff]  }
  0x7b   :  { %1339 = vmatpush1.bf16.msra.mxu0 %v4466_v3  ;;  %v4558_v3 = vld [vmem:[%s6468_s2 + $0x5a0] ss:$16 sps:$4 sm:$0xff]  }
  0x7c   :  { %1501 = vmatpush1.bf16.msra.mxu1 %v4469_v4  ;;  %1340 = vmatprep.subr.bf16.mxu0 %v4474_v5  ;;  %v4561_v4 = vld [vmem:[%s6468_s2 + $0x588] ss:$16 sps:$4 sm:$0xff]   ;;  %v4566_v5 = vld [vmem:[%s6468_s2 + $0x5c4] ss:$16 sps:$4 sm:$0xff]  }
  0x7d   :  { %1502 = vmatprep.subr.bf16.mxu1 %v4477_v6  ;;  %v4569_v6 = vld [vmem:[%s6468_s2 + $0x5ac] ss:$16 sps:$4 sm:$0xff]  }
  0x7f   :  { %1341 = vmatpush1.bf16.msra.mxu0 %v4472_v7  ;;  %v4564_v7 = vld [vmem:[%s6468_s2 + $0x5c0] ss:$16 sps:$4 sm:$0xff]  }
  0x80   :  { %1503 = vmatpush1.bf16.msra.mxu1 %v4475_v8  ;;  %1351 = vmatprep.subr.bf16.mxu0 %v4482_v9  ;;  %v4567_v8 = vld [vmem:[%s6468_s2 + $0x5a8] ss:$16 sps:$4 sm:$0xff]   ;;  %v4572_v9 = vld [vmem:[%s6468_s2 + $0x5e4] ss:$16 sps:$4 sm:$0xff]  }
  0x81   :  { %1504 = vmatprep.subr.bf16.mxu1 %v4485_v10  ;;  %v4575_v10 = vld [vmem:[%s6468_s2 + $0x5cc] ss:$16 sps:$4 sm:$0xff]  }
  0x82   :  { %1343 = vmatmul.mubr.bf16.vlgmr.msra.gmra.mrb[0].mxu0 %v3744_v11 }
  0x83   :  { %1352 = vmatpush1.bf16.msra.mxu0 %v4480_v12  ;;  %1383 = vmatprep.mubr.bf16.mxu0 %v3747_v18  ;;  %v4573_v12 = vld [vmem:[%s6468_s2 + $0x5c8] ss:$16 sps:$4 sm:$0xff]  }
  0x84   :  { %1505 = vmatpush1.bf16.msra.mxu1 %v4483_v13  ;;  %1353 = vmatprep.subr.bf16.mxu0 %v4488_v14  ;;  %v4580_v13 = vld [vmem:[%s6468_s2 + $0x5ec] ss:$16 sps:$4 sm:$0xff]   ;;  %v4584_v14 = vld [vmem:[%s6470_s4 + $0x40] sm:$0xff]  }
  0x85   :  { %1515 = vmatprep.subr.bf16.mxu1 %v4491_v15  ;;  %v4578_v15 = vld [vmem:[%s6468_s2 + $0x5e8] ss:$16 sps:$4 sm:$0xff]  }
  0x87   :  { %1507 = vmatmul.mubr.bf16.vlgmr.msra.gmra.mrb[4].mxu1 %v3744_v11  ;;  %1354 = vmatpush1.bf16.msra.mxu0 %v4486_v17  ;;  %v4570_v11 = vld [vmem:[%s6468_s2 + $0x5e0] ss:$16 sps:$4 sm:$0xff]  }
  0x88   :  { %1516 = vmatpush1.bf16.msra.mxu1 %v4489_v19  ;;  %1355 = vmatprep.subr.bf16.mxu0 %v4494_v20  ;;  %v4585_v17 = vld [vmem:[%s6470_s4] sm:$0xff]   ;;  %v4583_v19 = vld [vmem:[%s6468_s2 + $0x60c] ss:$16 sps:$4 sm:$0xff]  }
  0x89   :  { %1517 = vmatprep.subr.bf16.mxu1 %v4497_v21  ;;  %1547 = vmatprep.mubr.bf16.mxu1 %v3747_v18  ;;  %v3746_v18 = vcombine.low %v5447_v16, %v5447_v16  ;;  %v4586_v20 = vld [vmem:[%s6470_s4 + $0x48] sm:$0xff]  }
  0x8a   :  { %v4581_v21 = vld [vmem:[%s6468_s2 + $0x608] ss:$16 sps:$4 sm:$0xff]  }
  0x8b   :  { %1356 = vmatpush1.bf16.msra.mxu0 %v4492_v22  ;;  %v4587_v16 = vld [vmem:[%s6470_s4 + $0x8] sm:$0xff]   ;;  %v4588_v22 = vld [vmem:[%s6470_s4 + $0x50] sm:$0xff]  }
  0x8c   :  { %1518 = vmatpush1.bf16.msra.mxu1 %v4495_v23  ;;  %1357 = vmatprep.subr.bf16.mxu0 %v4500_v24  ;;  %v4589_v23 = vld [vmem:[%s6470_s4 + $0x10] sm:$0xff]   ;;  %v4591_v24 = vld [vmem:[%s6470_s4 + $0x58] sm:$0xff]  }
  0x8d   :  { %1519 = vmatprep.subr.bf16.mxu1 %v4503_v25  ;;  %v4592_v25 = vld [vmem:[%s6470_s4 + $0x18] sm:$0xff]  }
  0x8f   :  { %1358 = vmatpush1.bf16.msra.mxu0 %v4498_v26  ;;  %v4594_v26 = vld [vmem:[%s6470_s4 + $0x60] sm:$0xff]  }
  0x90   :  { %1520 = vmatpush1.bf16.msra.mxu1 %v4501_v27  ;;  %1359 = vmatprep.subr.bf16.mxu0 %v4506_v28  ;;  %v4590_v27 = vld [vmem:[%s6470_s4 + $0x80] sm:$0xff]  }
  0x91   :  { %1521 = vmatprep.subr.bf16.mxu1 %v4509_v29  ;;  %v4595_v28 = vld [vmem:[%s6470_s4 + $0x20] sm:$0xff]   ;;  %v4597_v29 = vld [vmem:[%s6470_s4 + $0x68] sm:$0xff]  }
  0x93   :  { %1360 = vmatpush1.bf16.msra.mxu0 %v4504_v30  ;;  %v4593_v30 = vld [vmem:[%s6470_s4 + $0x88] sm:$0xff]  }
  0x94   :  { %1522 = vmatpush1.bf16.msra.mxu1 %v4507_v31  ;;  %1361 = vmatprep.subr.bf16.mxu0 %v4512_v32  ;;  %v4937_v31 = vld [vmem:[%s6466_s0 + $0x18] ss:$0 sps:$4 sm:$0xff]   ;;  %v4596_v32 = vld [vmem:[%s6470_s4 + $0x90] sm:$0xff]  }
  0x95   :  { %1523 = vmatprep.subr.bf16.mxu1 %v4515_v33 }
  0x97   :  { %1362 = vmatpush1.bf16.msra.mxu0 %v4510_v34 }
  0x98   :  { %1524 = vmatpush1.bf16.msra.mxu1 %v4513_v35  ;;  %1363 = vmatprep.subr.bf16.mxu0 %v4518_v36 }
  0x99   :  { %1525 = vmatprep.subr.bf16.mxu1 %v4521_v37 }
  0x9b   :  { %1364 = vmatpush1.bf16.msra.mxu0 %v4516_v38 }
  0x9c   :  { %1526 = vmatpush1.bf16.msra.mxu1 %v4519_v39  ;;  %1365 = vmatprep.subr.bf16.mxu0 %v4524_v40 }
  0x9d   :  { %1527 = vmatprep.subr.bf16.mxu1 %v4527_v41 }
  0x9f   :  { %1366 = vmatpush1.bf16.msra.mxu0 %v4522_v42 }
  0xa0   :  { %1528 = vmatpush1.bf16.msra.mxu1 %v4525_v43  ;;  %1367 = vmatprep.subr.bf16.mxu0 %v4530_v44 }
  0xa1   :  { %1529 = vmatprep.subr.bf16.mxu1 %v4533_v45 }
  0xa3   :  { %1368 = vmatpush1.bf16.msra.mxu0 %v4528_v46 }
  0xa4   :  { %1530 = vmatpush1.bf16.msra.mxu1 %v4531_v47  ;;  %1369 = vmatprep.subr.bf16.mxu0 %v4536_v48 }
  0xa5   :  { %1531 = vmatprep.subr.bf16.mxu1 %v4539_v49 }
  0xa7   :  { %1370 = vmatpush1.bf16.msra.mxu0 %v4534_v50 }
  0xa8   :  { %1532 = vmatpush1.bf16.msra.mxu1 %v4537_v51  ;;  %1371 = vmatprep.subr.bf16.mxu0 %v4542_v52 }
  0xa9   :  { %1533 = vmatprep.subr.bf16.mxu1 %v4545_v53 }
  0xab   :  { %1372 = vmatpush1.bf16.msra.mxu0 %v4540_v54 }
  0xac   :  { %1534 = vmatpush1.bf16.msra.mxu1 %v4543_v55  ;;  %1373 = vmatprep.subr.bf16.mxu0 %v4548_v56 }
  0xad   :  { %1535 = vmatprep.subr.bf16.mxu1 %v4551_v57 }
  0xaf   :  { %1374 = vmatpush1.bf16.msra.mxu0 %v4546_v58 }
  0xb0   :  { %1536 = vmatpush1.bf16.msra.mxu1 %v4549_v59  ;;  %1375 = vmatprep.subr.bf16.mxu0 %v4554_v60 }
  0xb1   :  { %1537 = vmatprep.subr.bf16.mxu1 %v4557_v61 }
  0xb3   :  { %1376 = vmatpush1.bf16.msra.mxu0 %v4552_v62 }
  0xb4   :  { %1538 = vmatpush1.bf16.msra.mxu1 %v4555_v63  ;;  %1377 = vmatprep.subr.bf16.mxu0 %v4560_v0 }
  0xb5   :  { %1539 = vmatprep.subr.bf16.mxu1 %v4563_v1 }
  0xb7   :  { %1378 = vmatpush1.bf16.msra.mxu0 %v4558_v3 }
  0xb8   :  { %1540 = vmatpush1.bf16.msra.mxu1 %v4561_v4  ;;  %1379 = vmatprep.subr.bf16.mxu0 %v4566_v5 }
  0xb9   :  { %1541 = vmatprep.subr.bf16.mxu1 %v4569_v6 }
  0xbb   :  { %1380 = vmatpush1.bf16.msra.mxu0 %v4564_v7 }
  0xbc   :  { %1542 = vmatpush1.bf16.msra.mxu1 %v4567_v8  ;;  %1381 = vmatprep.subr.bf16.mxu0 %v4572_v9 }
  0xbd   :  { %1543 = vmatprep.subr.bf16.mxu1 %v4575_v10 }
  0xbf   :  { %1382 = vmatpush1.bf16.msra.mxu0 %v4570_v11 }
  0xc0   :  { %1544 = vmatpush1.bf16.msra.mxu1 %v4573_v12  ;;  %4192 = vmatprep.subr.bf16.mxu0 %v4584_v14 }
  0xc1   :  { %1545 = vmatprep.subr.bf16.mxu1 %v4580_v13 }
  0xc2   :  { %1384 = vmatmul.mubr.bf16.vlgmr.msra.gmra.mrb[0].mxu0 %v3746_v18 }
  0xc3   :  { %4193 = vmatpush3.bf16.msra.mxu0 %v4585_v17 }
  0xc4   :  { %1546 = vmatpush1.bf16.msra.mxu1 %v4578_v15  ;;  %4194 = vmatprep.subr.bf16.mxu0 %v4586_v20 }
  0xc5   :  { %1556 = vmatprep.subr.bf16.mxu1 %v4583_v19 }
  0xc7   :  { %1548 = vmatmul.mubr.bf16.vlgmr.msra.gmra.mrb[4].mxu1 %v3746_v18  ;;  %4195 = vmatpush3.bf16.msra.mxu0 %v4587_v16 }
  0xc8   :  { %1557 = vmatpush1.bf16.msra.mxu1 %v4581_v21  ;;  %1588 = vmatprep.mubr.bf16.mxu1 %v4962_v2 }
  0xc9   :  { %1855 = vmatprep.subr.bf16.mxu1 %v4962_v2  ;;  %4196 = vmatprep.subr.bf16.mxu0 %v4588_v22 }
  0xcb   :  { %4197 = vmatpush3.bf16.msra.mxu0 %v4589_v23 }
  0xcc   :  { %4198 = vmatprep.subr.bf16.mxu0 %v4591_v24 }
  0xcf   :  { %4199 = vmatpush3.bf16.msra.mxu0 %v4592_v25 }
  0xd0   :  { %4200 = vmatprep.subr.bf16.mxu0 %v4594_v26 }
  0xd3   :  { %3946 = vmatmul.mubr.msk.bf16.vlgmr.msra.gmra.mrb[4].mxu1 %vm1265_vm0, %v4937_v31  ;;  %4201 = vmatpush3.bf16.msra.mxu0 %v4595_v28 }
  0xd4   :  { %1856 = vmatpush1.bf16.msra.mxu1 %v4590_v27  ;;  %4202 = vmatprep.subr.bf16.mxu0 %v4597_v29 }
  0xd5   :  { %1857 = vmatprep.subr.bf16.mxu1 %v4962_v2 }
  0xd8   :  { %1858 = vmatpush1.bf16.msra.mxu1 %v4593_v30 }
  0xd9   :  { %1859 = vmatprep.subr.bf16.mxu1 %v4962_v2 }
  0xda   :  { %v1426_v33 = vpop.f32.mrb[0].mxu1 }
  0xdb   :  { %v1428_v34 = vpop.f32.mrb[1].mxu1 }
  0xdc   :  { %v1430_v35 = vpop.f32.mrb[2].mxu1  ;;  %1860 = vmatpush1.bf16.msra.mxu1 %v4596_v32 }
  0xdd   :  { %v1431_v36 = vpop.f32.mrb[3].mxu1  ;;  %1861 = vmatprep.subr.bf16.mxu1 %v4962_v2 }
  0xde   :  { %17 = vsyncpa [#allocation3], 0  ;;  %v4598_v37 = vld [vmem:[%s6470_s4 + $0x28] sm:$0xff]   ;;  %v4599_v38 = vld [vmem:[%s6470_s4 + $0x98] sm:$0xff]   ;;  %v241_v48 = vlaneseq  ;;  %s4963_s25 = smov 108  }
  0xdf   :  { %4203 = vmatpush3.bf16.msra.mxu0 %v4598_v37  ;;  %v4600_v39 = vld [vmem:[%s6470_s4 + $0x70] sm:$0xff]   ;;  %v4602_v41 = vld [vmem:[%s6470_s4 + $0xa0] sm:$0xff]   ;;  %v4603_v42 = vld [vmem:[%s6470_s4 + $0x78] sm:$0xff]  }
  0xe0   :  { %1862 = vmatpush1.bf16.msra.mxu1 %v4599_v38  ;;  %v4601_v40 = vld [vmem:[%s6470_s4 + $0x30] sm:$0xff]   ;;  %4204 = vmatprep.subr.bf16.mxu0 %v4600_v39  ;;  %v4604_v43 = vld [vmem:[%s6470_s4 + $0x38] sm:$0xff]   ;;  %v4605_v44 = vld [vmem:[%s6470_s4 + $0xa8] sm:$0xff]   ;;  %v5728_v49 = vshrl.u32 %v241_v48, 7 }
  0xe1   :  { %1863 = vmatprep.subr.bf16.mxu1 %v4962_v2  ;;  %v4606_v45 = vld [vmem:[%s6470_s4 + $0xb0] sm:$0xff]   ;;  %v4607_v46 = vld [vmem:[%s6470_s4 + $0xb8] sm:$0xff]   ;;  %v4608_v47 = vld [vmem:[%s6470_s4 + $0xc0] sm:$0xff]  }
  0xe2   :  { %v5731_v50 = vsub.s32 0, %v5728_v49  ;;  %v239_v51 = vld [vmem:[%s6469_s3] sm:$0xf]  ;;  %v5737_v52 = vsub.s32 1, %v5728_v49  ;;  %v5742_v4 = vsub.s32 2, %v5728_v49  ;;  %v5745_v5 = vsub.s32 3, %v5728_v49 }
  0xe3   :  { %4205 = vmatpush3.bf16.msra.mxu0 %v4601_v40  ;;  %v4609_v19 = vld [vmem:[%s6472_s6] ss:$16 sps:$4 sm:$0xff]   ;;  %v4611_v20 = vld [vmem:[%s6472_s6 + $0x4] ss:$16 sps:$4 sm:$0xff]   ;;  %v4612_v21 = vld [vmem:[%s6472_s6 + $0x8] ss:$16 sps:$4 sm:$0xff]  }
  0xe4   :  { %1864 = vmatpush1.bf16.msra.mxu1 %v4602_v41  ;;  %4206 = vmatprep.subr.bf16.mxu0 %v4603_v42  ;;  %v244_v53 = vrot.slane %v239_v51, %v5731_v50  ;;  %v248_v54 = vrot.slane %v239_v51, %v5737_v52  ;;  %v252_v6 = vrot.slane %v239_v51, %v5742_v4  ;;  %v4614_v16 = vld [vmem:[%s6472_s6 + $0xc] ss:$16 sps:$4 sm:$0xff]   ;;  %v4617_v22 = vld [vmem:[%s6472_s6 + $0x24] ss:$16 sps:$4 sm:$0xff]   ;;  %v4615_v24 = vld [vmem:[%s6472_s6 + $0x20] ss:$16 sps:$4 sm:$0xff]  }
  0xe5   :  { %1865 = vmatprep.subr.bf16.mxu1 %v4962_v2  ;;  %v256_v7 = vrot.slane %v239_v51, %v5745_v5  ;;  %v4620_v23 = vld [vmem:[%s6472_s6 + $0x2c] ss:$16 sps:$4 sm:$0xff]   ;;  %v4618_v25 = vld [vmem:[%s6472_s6 + $0x28] ss:$16 sps:$4 sm:$0xff]   ;;  %v4623_v26 = vld [vmem:[%s6472_s6 + $0x44] ss:$16 sps:$4 sm:$0xff]  }
  0xe6   :  { %v4626_v27 = vld [vmem:[%s6472_s6 + $0x4c] ss:$16 sps:$4 sm:$0xff]   ;;  %v4621_v28 = vld [vmem:[%s6472_s6 + $0x40] ss:$16 sps:$4 sm:$0xff]   ;;  %v4624_v29 = vld [vmem:[%s6472_s6 + $0x48] ss:$16 sps:$4 sm:$0xff]  }
  0xe7   :  { %4207 = vmatpush3.bf16.msra.mxu0 %v4604_v43  ;;  %v4629_v35 = vld [vmem:[%s6472_s6 + $0x64] ss:$16 sps:$4 sm:$0xff]   ;;  %v4632_v36 = vld [vmem:[%s6472_s6 + $0x6c] ss:$16 sps:$4 sm:$0xff]   ;;  %v4627_v37 = vld [vmem:[%s6472_s6 + $0x60] ss:$16 sps:$4 sm:$0xff]  }
  0xe8   :  { %1866 = vmatpush1.bf16.msra.mxu1 %v4605_v44  ;;  %2119 = vmatprep.subr.bf16.mxu0 %v4611_v20  ;;  %v4630_v38 = vld [vmem:[%s6472_s6 + $0x68] ss:$16 sps:$4 sm:$0xff]   ;;  %v4635_v39 = vld [vmem:[%s6472_s6 + $0x84] ss:$16 sps:$4 sm:$0xff]   ;;  %v4638_v40 = vld [vmem:[%s6472_s6 + $0x8c] ss:$16 sps:$4 sm:$0xff]  }
  0xe9   :  { %1867 = vmatprep.subr.bf16.mxu1 %v4962_v2  ;;  %v4633_v41 = vld [vmem:[%s6472_s6 + $0x80] ss:$16 sps:$4 sm:$0xff]   ;;  %v4636_v42 = vld [vmem:[%s6472_s6 + $0x88] ss:$16 sps:$4 sm:$0xff]   ;;  %v4641_v43 = vld [vmem:[%s6472_s6 + $0xa4] ss:$16 sps:$4 sm:$0xff]  }
  0xea   :  { %v4644_v44 = vld [vmem:[%s6472_s6 + $0xac] ss:$16 sps:$4 sm:$0xff]   ;;  %v4647_v48 = vld [vmem:[%s6472_s6 + $0xc4] ss:$16 sps:$4 sm:$0xff]  }
  0xeb   :  { %v4650_v51 = vld [vmem:[%s6472_s6 + $0xcc] ss:$16 sps:$4 sm:$0xff]  }
  0xec   :  { %1868 = vmatpush1.bf16.msra.mxu1 %v4606_v45  ;;  %v3947_v45 = vld [vmem:[%s6471_s5] ss:$0 sm:$0xff] }
  0xed   :  { %1869 = vmatprep.subr.bf16.mxu1 %v4962_v2  ;;  %v4666_v20 = vld [vmem:[%s6474_s8 + $0x40] ss:$28 sps:$4 sm:$0xff]  }
  0xf0   :  { %1870 = vmatpush1.bf16.msra.mxu1 %v4607_v46  ;;  %v4639_v46 = vld [vmem:[%s6472_s6 + $0xa0] ss:$16 sps:$4 sm:$0xff]  }
  0xf1   :  { %1871 = vmatprep.subr.bf16.mxu1 %v4962_v2 }
  0xf4   :  { %1872 = vmatpush1.bf16.msra.mxu1 %v4608_v47  ;;  %v4642_v47 = vld [vmem:[%s6472_s6 + $0xa8] ss:$16 sps:$4 sm:$0xff]  }
  0xf5   :  { %2160 = vmatprep.subr.bf16.mxu1 %v4614_v16  ;;  %v4674_v16 = vld [vmem:[%s6474_s8 + $0x7c] ss:$28 sps:$4 sm:$0xff]  }
 0x195   :  { %v1385_v55 = vpop.f32.mrb[0].mxu0 }
 0x196   :  { %v4236_v56 = vadd.f32 %v1385_v55, %v244_v53  ;;  %v1387_v57 = vpop.f32.mrb[1].mxu0  ;;  %v4645_v55 = vld [vmem:[%s6472_s6 + $0xc0] ss:$16 sps:$4 sm:$0xff]  }
 0x197   :  { %v4238_v58 = vadd.f32 %v1387_v57, %v248_v54  ;;  %v1389_v59 = vpop.f32.mrb[2].mxu0 }
 0x198   :  { %v4237_v60 = vadd.f32 %v4236_v56, %v1426_v33  ;;  %v1390_v61 = vpop.f32.mrb[3].mxu0  ;;  %v4648_v56 = vld [vmem:[%s6472_s6 + $0xc8] ss:$16 sps:$4 sm:$0xff]   ;;  %v4653_v59 = vld [vmem:[%s6472_s6 + $0xe4] ss:$16 sps:$4 sm:$0xff]  }
 0x199   :  { %v4239_v62 = vadd.f32 %v4238_v58, %v1428_v34 }
 0x19a   :  { %v1597_v63 = vmax.f32 %v4237_v60, 0.0  ;;  %v4656_v60 = vld [vmem:[%s6472_s6 + $0xec] ss:$16 sps:$4 sm:$0xff]  }
 0x19b   :  { %v1598_v0 = vmax.f32 %v4239_v62, 0.0 }
 0x19c   :  { %v1601_v3 = vpack.c.bf16 %v1597_v63, %v1597_v63  ;;  %v4651_v63 = vld [vmem:[%s6472_s6 + $0xe0] ss:$16 sps:$4 sm:$0xff]  }
 0x19d   :  { %v1602_v1 = vpack.c.bf16 %v1598_v0, %v1598_v0  ;;  %v4654_v0 = vld [vmem:[%s6472_s6 + $0xe8] ss:$16 sps:$4 sm:$0xff]  }
 0x19f   :  { %1847 = vmatprep.mubr.bf16.mxu0 %v1602_v1  ;;  %v4659_v1 = vld [vmem:[%s6474_s8 + $0x4] ss:$28 sps:$4 sm:$0xff]  }
 0x1a0   :  { %1848 = vmatmul.mubr.bf16.vlgmr.msra.gmra.mrb[4].mxu0 %v1601_v3  ;;  %v4662_v3 = vld [vmem:[%s6474_s8 + $0xc] ss:$28 sps:$4 sm:$0xff]  }
 0x1a1   :  { %2151 = vmatprep.mubr.bf16.mxu0 %v4962_v2  ;;  %2120 = vmatpush1.bf16.msra.mxu0 %v4609_v19  ;;  %v4663_v19 = vld [vmem:[%s6474_s8 + $0x38] ss:$28 sps:$4 sm:$0xff]  }
 0x1a2   :  { %2121 = vmatprep.subr.bf16.mxu0 %v4617_v22  ;;  %v4669_v22 = vld [vmem:[%s6474_s8 + $0x70] ss:$28 sps:$4 sm:$0xff]  }
 0x1a5   :  { %2122 = vmatpush1.bf16.msra.mxu0 %v4615_v24  ;;  %v4677_v24 = vld [vmem:[%s6474_s8 + $0xac] ss:$28 sps:$4 sm:$0xff]  }
 0x1a6   :  { %v1590_v8 = vpop.f32.mrb[4].mxu1  ;;  %2123 = vmatprep.subr.bf16.mxu0 %v4623_v26  ;;  %v4675_v26 = vld [vmem:[%s6474_s8 + $0xa8] ss:$28 sps:$4 sm:$0xff]  }
 0x1a7   :  { %v4240_v9 = vadd.f32 %v1590_v8, %v252_v6  ;;  %v1592_v10 = vpop.f32.mrb[5].mxu1 }
 0x1a8   :  { %v4241_v11 = vadd.f32 %v1592_v10, %v256_v7  ;;  %v1594_v12 = vpop.f32.mrb[6].mxu1 }
 0x1a9   :  { %v1599_v13 = vmax.f32 %v4240_v9, 0.0  ;;  %v1595_v14 = vpop.f32.mrb[7].mxu1  ;;  %2124 = vmatpush1.bf16.msra.mxu0 %v4621_v28  ;;  %v1901_v9 = vld [vmem:[%s6467_s1] sm:$0xff] }
 0x1aa   :  { %v1600_v15 = vmax.f32 %v4241_v11, 0.0  ;;  %2125 = vmatprep.subr.bf16.mxu0 %v4629_v35  ;;  %v4660_v14 = vld [vmem:[%s6474_s8 + $0x8] ss:$28 sps:$4 sm:$0xff]   ;;  %v4690_v35 = vld [vmem:[%s6474_s8 + $0x120] ss:$28 sps:$4 sm:$0xff]  }
 0x1ab   :  { %v1603_v18 = vpack.c.bf16 %v1599_v13, %v1599_v13  ;;  %v4657_v13 = vld [vmem:[%s6474_s8] ss:$28 sps:$4 sm:$0xff]  }
 0x1ac   :  { %v1604_v17 = vpack.c.bf16 %v1600_v15, %v1600_v15  ;;  %v4683_v28 = vld [vmem:[%s6474_s8 + $0xe4] ss:$28 sps:$4 sm:$0xff]  }
 0x1ad   :  { %2126 = vmatpush1.bf16.msra.mxu0 %v4627_v37  ;;  %v4698_v37 = vld [vmem:[%s6474_s8 + $0x15c] ss:$28 sps:$4 sm:$0xff]  }
 0x1ae   :  { %3973 = vmatprep.mubr.msk.bf16.mxu1 %vm1265_vm0, %v1604_v17  ;;  %2127 = vmatprep.subr.bf16.mxu0 %v4635_v39  ;;  %v4665_v17 = vld [vmem:[%s6474_s8 + $0x3c] ss:$28 sps:$4 sm:$0xff]  }
 0x1af   :  { %1888 = vmatmul.mubr.bf16.vlgmr.msra.gmra.mrb[8].mxu1 %v1603_v18  ;;  %v4668_v18 = vld [vmem:[%s6474_s8 + $0x44] ss:$28 sps:$4 sm:$0xff]   ;;  %v4696_v39 = vld [vmem:[%s6474_s8 + $0x158] ss:$28 sps:$4 sm:$0xff]  }
 0x1b0   :  { %2192 = vmatprep.mubr.bf16.mxu1 %v4962_v2  ;;  %2161 = vmatpush1.bf16.msra.mxu1 %v4612_v21  ;;  %v4671_v21 = vld [vmem:[%s6474_s8 + $0x74] ss:$28 sps:$4 sm:$0xff]  }
 0x1b1   :  { %2162 = vmatprep.subr.bf16.mxu1 %v4620_v23  ;;  %2128 = vmatpush1.bf16.msra.mxu0 %v4633_v41  ;;  %v4672_v23 = vld [vmem:[%s6474_s8 + $0x78] ss:$28 sps:$4 sm:$0xff]  }
 0x1b2   :  { %2129 = vmatprep.subr.bf16.mxu0 %v4641_v43  ;;  %v4704_v41 = vld [vmem:[%s6474_s8 + $0x194] ss:$28 sps:$4 sm:$0xff]  }
 0x1b3   :  { %v4702_v43 = vld [vmem:[%s6474_s8 + $0x190] ss:$28 sps:$4 sm:$0xff]  }
 0x1b4   :  { %2163 = vmatpush1.bf16.msra.mxu1 %v4618_v25  ;;  %v4680_v25 = vld [vmem:[%s6474_s8 + $0xb4] ss:$28 sps:$4 sm:$0xff]  }
 0x1b5   :  { %2164 = vmatprep.subr.bf16.mxu1 %v4626_v27  ;;  %2130 = vmatpush1.bf16.msra.mxu0 %v4639_v46  ;;  %v4678_v27 = vld [vmem:[%s6474_s8 + $0xb0] ss:$28 sps:$4 sm:$0xff]   ;;  %v4705_v46 = vld [vmem:[%s6474_s8 + $0x1c0] ss:$28 sps:$4 sm:$0xff]  }
 0x1b6   :  { %2131 = vmatprep.subr.bf16.mxu0 %v4647_v48  ;;  %v4713_v48 = vld [vmem:[%s6474_s8 + $0x1fc] ss:$28 sps:$4 sm:$0xff]  }
 0x1b8   :  { %2165 = vmatpush1.bf16.msra.mxu1 %v4624_v29  ;;  %v4686_v29 = vld [vmem:[%s6474_s8 + $0xec] ss:$28 sps:$4 sm:$0xff]  }
 0x1b9   :  { %2166 = vmatprep.subr.bf16.mxu1 %v4632_v36  ;;  %2132 = vmatpush1.bf16.msra.mxu0 %v4645_v55  ;;  %v4695_v36 = vld [vmem:[%s6474_s8 + $0x154] ss:$28 sps:$4 sm:$0xff]  }
 0x1ba   :  { %2133 = vmatprep.subr.bf16.mxu0 %v4653_v59  ;;  %v4719_v55 = vld [vmem:[%s6474_s8 + $0x234] ss:$28 sps:$4 sm:$0xff]   ;;  %v4725_v59 = vld [vmem:[%s6474_s8 + $0x26c] ss:$28 sps:$4 sm:$0xff]  }
 0x1bc   :  { %2167 = vmatpush1.bf16.msra.mxu1 %v4630_v38  ;;  %v4693_v38 = vld [vmem:[%s6474_s8 + $0x150] ss:$28 sps:$4 sm:$0xff]  }
 0x1bd   :  { %2168 = vmatprep.subr.bf16.mxu1 %v4638_v40  ;;  %2134 = vmatpush1.bf16.msra.mxu0 %v4651_v63  ;;  %v4701_v40 = vld [vmem:[%s6474_s8 + $0x18c] ss:$28 sps:$4 sm:$0xff]   ;;  %v4731_v63 = vld [vmem:[%s6474_s8 + $0x2a4] ss:$28 sps:$4 sm:$0xff]  }
 0x1be   :  { %3349 = vmatprep.subr.bf16.mxu0 %v4659_v1  ;;  %v4729_v1 = vld [vmem:[%s6474_s8 + $0x2a0] ss:$28 sps:$4 sm:$0xff]  }
 0x1c0   :  { %2169 = vmatpush1.bf16.msra.mxu1 %v4636_v42  ;;  %v4699_v42 = vld [vmem:[%s6474_s8 + $0x188] ss:$28 sps:$4 sm:$0xff]  }
 0x1c1   :  { %2170 = vmatprep.subr.bf16.mxu1 %v4644_v44  ;;  %v4707_v44 = vld [vmem:[%s6474_s8 + $0x1c4] ss:$28 sps:$4 sm:$0xff]  }
 0x1c4   :  { %2171 = vmatpush1.bf16.msra.mxu1 %v4642_v47  ;;  %v4708_v47 = vld [vmem:[%s6474_s8 + $0x1c8] ss:$28 sps:$4 sm:$0xff]  }
 0x1c5   :  { %2172 = vmatprep.subr.bf16.mxu1 %v4650_v51  ;;  %v4716_v51 = vld [vmem:[%s6474_s8 + $0x204] ss:$28 sps:$4 sm:$0xff]  }
 0x1c8   :  { %2173 = vmatpush1.bf16.msra.mxu1 %v4648_v56  ;;  %v4722_v56 = vld [vmem:[%s6474_s8 + $0x23c] ss:$28 sps:$4 sm:$0xff]  }
 0x1c9   :  { %2174 = vmatprep.subr.bf16.mxu1 %v4656_v60  ;;  %v4728_v60 = vld [vmem:[%s6474_s8 + $0x274] ss:$28 sps:$4 sm:$0xff]  }
 0x1cc   :  { %2175 = vmatpush1.bf16.msra.mxu1 %v4654_v0  ;;  %v4734_v0 = vld [vmem:[%s6474_s8 + $0x2ac] ss:$28 sps:$4 sm:$0xff]  }
 0x1cd   :  { %3431 = vmatprep.subr.bf16.mxu1 %v4662_v3  ;;  %v4732_v3 = vld [vmem:[%s6474_s8 + $0x2a8] ss:$28 sps:$4 sm:$0xff]  }
 0x273   :  { %v4208_v30 = vpop.f32.mrb[4].mxu0 }
 0x274   :  { %v4209_v31 = vpop.f32.mrb[5].mxu0 }
 0x275   :  { %v4210_v32 = vadd.f32 %v4209_v31, %v4208_v30  ;;  %v4211_v33 = vpop.f32.mrb[6].mxu0  ;;  %v4681_v30 = vld [vmem:[%s6474_s8 + $0xe0] ss:$28 sps:$4 sm:$0xff]   ;;  %v4684_v31 = vld [vmem:[%s6474_s8 + $0xe8] ss:$28 sps:$4 sm:$0xff]  }
 0x276   :  { %v4212_v34 = vpop.f32.mrb[7].mxu0  ;;  %v4692_v33 = vld [vmem:[%s6474_s8 + $0x124] ss:$28 sps:$4 sm:$0xff]  }
 0x277   :  { %v1850_v53 = vadd.f32 %v4210_v32, %v3947_v45  ;;  %v4689_v32 = vld [vmem:[%s6474_s8 + $0x11c] ss:$28 sps:$4 sm:$0xff]   ;;  %v4710_v45 = vld [vmem:[%s6474_s8 + $0x1cc] ss:$28 sps:$4 sm:$0xff]  }
 0x278   :  { %v4687_v34 = vld [vmem:[%s6474_s8 + $0x118] ss:$28 sps:$4 sm:$0xff]  }
 0x282   :  { %v1889_v54 = vpop.f32.mrb[8].mxu1 }
 0x283   :  { %v1890_v57 = vadd.f32 %v1889_v54, %v1850_v53  ;;  %v1891_v58 = vpop.f32.mrb[9].mxu1  ;;  %v4711_v53 = vld [vmem:[%s6474_s8 + $0x1f8] ss:$28 sps:$4 sm:$0xff]   ;;  %v4714_v54 = vld [vmem:[%s6474_s8 + $0x200] ss:$28 sps:$4 sm:$0xff]  }
 0x284   :  { %v1892_v61 = vpop.f32.mrb[10].mxu1  ;;  %v4720_v58 = vld [vmem:[%s6474_s8 + $0x238] ss:$28 sps:$4 sm:$0xff]  }
 0x285   :  { %1895 = vst [vmem:[%s6477_s11] sm:$0xff] %v1890_v57  ;;  %v1893_v62 = vpop.f32.mrb[11].mxu1  ;;  %1896 = vrot.lane.b32.xlu0 %v1890_v57, %s4963_s25  ;;  %v4723_v61 = vld [vmem:[%s6474_s8 + $0x268] ss:$28 sps:$4 sm:$0xff]  }
 0x286   :  { %v4726_v62 = vld [vmem:[%s6474_s8 + $0x270] ss:$28 sps:$4 sm:$0xff]  }
 0x2f7   :  { %v1897_v6 = vpop.permute.xlu0 %1896 }
 0x2f8   :  { %v1898_v7 = vmul.f32 0.5, %v1897_v6  ;;  %v4737_v6 = vld [vmem:[%s6474_s8 + $0x2dc] ss:$28 sps:$4 sm:$0xff]  }
 0x2fa   :  { %v1899_v8 = vmul.f32 1.442695, %v1898_v7  ;;  %v4740_v7 = vld [vmem:[%s6474_s8 + $0x2e4] ss:$28 sps:$4 sm:$0xff]  }
 0x2fc   :  { %4907 = vpow2.f32 %v1899_v8  ;;  %v4735_v8 = vld [vmem:[%s6474_s8 + $0x2d8] ss:$28 sps:$4 sm:$0xff]  }
 0x306   :  { %v4908_v10 = vpop.eup %4907 }
 0x307   :  { %v1902_v11 = vmul.f32 %v4908_v10, %v1901_v9  ;;  %v4738_v9 = vld [vmem:[%s6474_s8 + $0x2e0] ss:$28 sps:$4 sm:$0xff]   ;;  %v4743_v10 = vld [vmem:[%s6474_s8 + $0x314] ss:$28 sps:$4 sm:$0xff]  }
 0x309   :  { %v1903_v12 = vadd.f32 %v1902_v11, %v1890_v57  ;;  %v4717_v57 = vld [vmem:[%s6474_s8 + $0x230] ss:$28 sps:$4 sm:$0xff]   ;;  %v4746_v11 = vld [vmem:[%s6474_s8 + $0x31c] ss:$28 sps:$4 sm:$0xff]  }
 0x30b   :  { %v1904_v15 = vpack.c.bf16 %v1903_v12, %v1903_v12  ;;  %v4741_v12 = vld [vmem:[%s6474_s8 + $0x310] ss:$28 sps:$4 sm:$0xff]  }
 0x30d   :  { %2152 = vmatmul.mubr.bf16.vlgmr.msra.gmra.mrb[8].mxu0 %v1904_v15  ;;  %2193 = vmatmul.mubr.bf16.vlgmr.msra.gmra.mrb[12].mxu1 %v1904_v15  ;;  %v4752_v15 = vld [vmem:[%s6474_s8 + $0x354] ss:$28 sps:$4 sm:$0xff]  }
 0x30e   :  { %3350 = vmatpush1.bf16.msra.mxu0 %v4657_v13  ;;  %3432 = vmatpush1.bf16.msra.mxu1 %v4660_v14  ;;  %v4744_v13 = vld [vmem:[%s6474_s8 + $0x318] ss:$28 sps:$4 sm:$0xff]   ;;  %v4749_v14 = vld [vmem:[%s6474_s8 + $0x34c] ss:$28 sps:$4 sm:$0xff]  }
 0x30f   :  { %3351 = vmatprep.subr.bf16.mxu0 %v4665_v17  ;;  %3433 = vmatprep.subr.bf16.mxu1 %v4668_v18  ;;  %v4747_v17 = vld [vmem:[%s6474_s8 + $0x348] ss:$28 sps:$4 sm:$0xff]   ;;  %v4750_v18 = vld [vmem:[%s6474_s8 + $0x350] ss:$28 sps:$4 sm:$0xff]  }
 0x312   :  { %3352 = vmatpush1.bf16.msra.mxu0 %v4663_v19  ;;  %3434 = vmatpush1.bf16.msra.mxu1 %v4666_v20  ;;  %v4755_v19 = vld [vmem:[%s6474_s8 + $0x384] ss:$28 sps:$4 sm:$0xff]   ;;  %v4758_v20 = vld [vmem:[%s6474_s8 + $0x38c] ss:$28 sps:$4 sm:$0xff]  }
 0x313   :  { %3353 = vmatprep.subr.bf16.mxu0 %v4671_v21  ;;  %3435 = vmatprep.subr.bf16.mxu1 %v4674_v16  ;;  %v6058_v21 = vld [vmem:[%s6473_s7] sm:$0xf] }
 0x314   :  { %v1942_v16 = vrot.slane %v6058_v21, %v5731_v50 }
 0x316   :  { %3354 = vmatpush1.bf16.msra.mxu0 %v4669_v22  ;;  %3436 = vmatpush1.bf16.msra.mxu1 %v4672_v23  ;;  %v1946_v22 = vrot.slane %v6058_v21, %v5737_v52  ;;  %v1954_v23 = vrot.slane %v6058_v21, %v5745_v5 }
 0x317   :  { %3355 = vmatprep.subr.bf16.mxu0 %v4677_v24  ;;  %3437 = vmatprep.subr.bf16.mxu1 %v4680_v25 }
 0x31a   :  { %3356 = vmatpush1.bf16.msra.mxu0 %v4675_v26  ;;  %3438 = vmatpush1.bf16.msra.mxu1 %v4678_v27 }
 0x31b   :  { %3357 = vmatprep.subr.bf16.mxu0 %v4683_v28  ;;  %3439 = vmatprep.subr.bf16.mxu1 %v4686_v29 }
 0x31e   :  { %3358 = vmatpush1.bf16.msra.mxu0 %v4681_v30  ;;  %3440 = vmatpush1.bf16.msra.mxu1 %v4684_v31 }
 0x31f   :  { %3359 = vmatprep.subr.bf16.mxu0 %v4689_v32  ;;  %3441 = vmatprep.subr.bf16.mxu1 %v4692_v33 }
 0x322   :  { %3360 = vmatpush1.bf16.msra.mxu0 %v4687_v34  ;;  %3442 = vmatpush1.bf16.msra.mxu1 %v4690_v35 }
 0x323   :  { %3361 = vmatprep.subr.bf16.mxu0 %v4695_v36  ;;  %3443 = vmatprep.subr.bf16.mxu1 %v4698_v37 }
 0x326   :  { %3362 = vmatpush1.bf16.msra.mxu0 %v4693_v38  ;;  %3444 = vmatpush1.bf16.msra.mxu1 %v4696_v39  ;;  %v4753_v39 = vld [vmem:[%s6474_s8 + $0x380] ss:$28 sps:$4 sm:$0xff]  }
 0x327   :  { %3363 = vmatprep.subr.bf16.mxu0 %v4701_v40  ;;  %3445 = vmatprep.subr.bf16.mxu1 %v4704_v41  ;;  %v4756_v40 = vld [vmem:[%s6474_s8 + $0x388] ss:$28 sps:$4 sm:$0xff]  }
 0x32a   :  { %3364 = vmatpush1.bf16.msra.mxu0 %v4699_v42  ;;  %3446 = vmatpush1.bf16.msra.mxu1 %v4702_v43  ;;  %v4761_v42 = vld [vmem:[%s6474_s8 + $0x3bc] ss:$28 sps:$4 sm:$0xff]   ;;  %v4764_v43 = vld [vmem:[%s6474_s8 + $0x3c4] ss:$28 sps:$4 sm:$0xff]  }
 0x32b   :  { %3365 = vmatprep.subr.bf16.mxu0 %v4707_v44  ;;  %3447 = vmatprep.subr.bf16.mxu1 %v4710_v45  ;;  %v4759_v45 = vld [vmem:[%s6474_s8 + $0x3b8] ss:$28 sps:$4 sm:$0xff]  }
 0x32e   :  { %3366 = vmatpush1.bf16.msra.mxu0 %v4705_v46  ;;  %3448 = vmatpush1.bf16.msra.mxu1 %v4708_v47  ;;  %v4762_v46 = vld [vmem:[%s6474_s8 + $0x3c0] ss:$28 sps:$4 sm:$0xff]   ;;  %v4767_v47 = vld [vmem:[%s6474_s8 + $0x3f4] ss:$28 sps:$4 sm:$0xff]  }
 0x32f   :  { %3367 = vmatprep.subr.bf16.mxu0 %v4713_v48  ;;  %3449 = vmatprep.subr.bf16.mxu1 %v4716_v51  ;;  %v4770_v48 = vld [vmem:[%s6474_s8 + $0x3fc] ss:$28 sps:$4 sm:$0xff]   ;;  %v4765_v51 = vld [vmem:[%s6474_s8 + $0x3f0] ss:$28 sps:$4 sm:$0xff]  }
 0x332   :  { %3368 = vmatpush1.bf16.msra.mxu0 %v4711_v53  ;;  %3450 = vmatpush1.bf16.msra.mxu1 %v4714_v54  ;;  %v4768_v53 = vld [vmem:[%s6474_s8 + $0x3f8] ss:$28 sps:$4 sm:$0xff]   ;;  %v4773_v54 = vld [vmem:[%s6474_s8 + $0x42c] ss:$28 sps:$4 sm:$0xff]  }
 0x333   :  { %3369 = vmatprep.subr.bf16.mxu0 %v4719_v55  ;;  %3451 = vmatprep.subr.bf16.mxu1 %v4722_v56  ;;  %v4776_v55 = vld [vmem:[%s6474_s8 + $0x434] ss:$28 sps:$4 sm:$0xff]   ;;  %v4771_v56 = vld [vmem:[%s6474_s8 + $0x428] ss:$28 sps:$4 sm:$0xff]  }
 0x336   :  { %3370 = vmatpush1.bf16.msra.mxu0 %v4717_v57  ;;  %3452 = vmatpush1.bf16.msra.mxu1 %v4720_v58  ;;  %v4774_v57 = vld [vmem:[%s6474_s8 + $0x430] ss:$28 sps:$4 sm:$0xff]   ;;  %v4779_v58 = vld [vmem:[%s6474_s8 + $0x464] ss:$28 sps:$4 sm:$0xff]  }
 0x337   :  { %3371 = vmatprep.subr.bf16.mxu0 %v4725_v59  ;;  %3453 = vmatprep.subr.bf16.mxu1 %v4728_v60  ;;  %v4782_v59 = vld [vmem:[%s6474_s8 + $0x46c] ss:$28 sps:$4 sm:$0xff]   ;;  %v4777_v60 = vld [vmem:[%s6474_s8 + $0x460] ss:$28 sps:$4 sm:$0xff]  }
 0x33a   :  { %3372 = vmatpush1.bf16.msra.mxu0 %v4723_v61  ;;  %3454 = vmatpush1.bf16.msra.mxu1 %v4726_v62  ;;  %v4780_v61 = vld [vmem:[%s6474_s8 + $0x468] ss:$28 sps:$4 sm:$0xff]   ;;  %v4785_v62 = vld [vmem:[%s6474_s8 + $0x49c] ss:$28 sps:$4 sm:$0xff]  }
 0x33b   :  { %3373 = vmatprep.subr.bf16.mxu0 %v4731_v63  ;;  %3455 = vmatprep.subr.bf16.mxu1 %v4734_v0  ;;  %v4788_v63 = vld [vmem:[%s6474_s8 + $0x4a4] ss:$28 sps:$4 sm:$0xff]   ;;  %v4783_v0 = vld [vmem:[%s6474_s8 + $0x498] ss:$28 sps:$4 sm:$0xff]  }
 0x33e   :  { %3374 = vmatpush1.bf16.msra.mxu0 %v4729_v1  ;;  %3456 = vmatpush1.bf16.msra.mxu1 %v4732_v3  ;;  %v4786_v1 = vld [vmem:[%s6474_s8 + $0x4a0] ss:$28 sps:$4 sm:$0xff]   ;;  %v4791_v3 = vld [vmem:[%s6474_s8 + $0x4d4] ss:$28 sps:$4 sm:$0xff]  }
 0x33f   :  { %3375 = vmatprep.subr.bf16.mxu0 %v4737_v6  ;;  %3457 = vmatprep.subr.bf16.mxu1 %v4740_v7  ;;  %v4794_v6 = vld [vmem:[%s6474_s8 + $0x4dc] ss:$28 sps:$4 sm:$0xff]   ;;  %v4789_v7 = vld [vmem:[%s6474_s8 + $0x4d0] ss:$28 sps:$4 sm:$0xff]  }
 0x342   :  { %3376 = vmatpush1.bf16.msra.mxu0 %v4735_v8  ;;  %3458 = vmatpush1.bf16.msra.mxu1 %v4738_v9  ;;  %v4792_v8 = vld [vmem:[%s6474_s8 + $0x4d8] ss:$28 sps:$4 sm:$0xff]   ;;  %v1950_v9 = vrot.slane %v6058_v21, %v5742_v4 }
 0x343   :  { %3377 = vmatprep.subr.bf16.mxu0 %v4743_v10  ;;  %3459 = vmatprep.subr.bf16.mxu1 %v4746_v11  ;;  %v4797_v10 = vld [vmem:[%s6474_s8 + $0x50c] ss:$28 sps:$4 sm:$0xff]   ;;  %v4800_v11 = vld [vmem:[%s6474_s8 + $0x514] ss:$28 sps:$4 sm:$0xff]  }
 0x344   :  { %v4809_v21 = vld [vmem:[%s6474_s8 + $0x14] ss:$28 sps:$4 sm:$0xff]  }
 0x346   :  { %3378 = vmatpush1.bf16.msra.mxu0 %v4741_v12  ;;  %3460 = vmatpush1.bf16.msra.mxu1 %v4744_v13  ;;  %v4795_v12 = vld [vmem:[%s6474_s8 + $0x508] ss:$28 sps:$4 sm:$0xff]   ;;  %v4798_v13 = vld [vmem:[%s6474_s8 + $0x510] ss:$28 sps:$4 sm:$0xff]  }
 0x347   :  { %3379 = vmatprep.subr.bf16.mxu0 %v4749_v14  ;;  %3461 = vmatprep.subr.bf16.mxu1 %v4752_v15  ;;  %v4803_v15 = vld [vmem:[%s6474_s8 + $0x544] ss:$28 sps:$4 sm:$0xff]  }
 0x34a   :  { %3380 = vmatpush1.bf16.msra.mxu0 %v4747_v17  ;;  %3462 = vmatpush1.bf16.msra.mxu1 %v4750_v18  ;;  %v4806_v17 = vld [vmem:[%s6474_s8 + $0x54c] ss:$28 sps:$4 sm:$0xff]   ;;  %v4801_v18 = vld [vmem:[%s6474_s8 + $0x540] ss:$28 sps:$4 sm:$0xff]  }
 0x34b   :  { %3390 = vmatprep.subr.bf16.mxu0 %v4755_v19  ;;  %3472 = vmatprep.subr.bf16.mxu1 %v4758_v20  ;;  %v4804_v19 = vld [vmem:[%s6474_s8 + $0x548] ss:$28 sps:$4 sm:$0xff]  }
 0x3e0   :  { %v2153_v24 = vpop.f32.mrb[8].mxu0  ;;  %v6066_v25 = vpop.f32.mrb[12].mxu1 }
 0x3e1   :  { %v2154_v26 = vadd.f32 %v2153_v24, %v1942_v16  ;;  %v2155_v27 = vpop.f32.mrb[9].mxu0  ;;  %v2196_v28 = vpop.f32.mrb[13].mxu1  ;;  %v2195_v14 = vadd.f32 %v6066_v25, %v1950_v9  ;;  %v4810_v16 = vld [vmem:[%s6474_s8 + $0x1d8] ss:$28 sps:$4 sm:$0xff]   ;;  %v4814_v25 = vld [vmem:[%s6474_s8 + $0x4c] ss:$28 sps:$4 sm:$0xff]  }
 0x3e2   :  { %v2156_v29 = vadd.f32 %v2155_v27, %v1946_v22  ;;  %v2197_v30 = vadd.f32 %v2196_v28, %v1954_v23  ;;  %v2157_v31 = vpop.f32.mrb[10].mxu0  ;;  %v2198_v32 = vpop.f32.mrb[14].mxu1  ;;  %v4807_v22 = vld [vmem:[%s6474_s8 + $0x10] ss:$28 sps:$4 sm:$0xff]   ;;  %v4811_v24 = vld [vmem:[%s6474_s8 + $0x18] ss:$28 sps:$4 sm:$0xff]  }
 0x3e3   :  { %v2201_v33 = vmax.f32 %v2154_v26, 0.0  ;;  %v2158_v34 = vpop.f32.mrb[11].mxu0  ;;  %v2199_v35 = vpop.f32.mrb[15].mxu1  ;;  %v2203_v20 = vmax.f32 %v2195_v14, 0.0  ;;  %v4815_v26 = vld [vmem:[%s6474_s8 + $0x210] ss:$28 sps:$4 sm:$0xff]  }
 0x3e4   :  { %v2202_v36 = vmax.f32 %v2156_v29, 0.0  ;;  %v2204_v37 = vmax.f32 %v2197_v30, 0.0  ;;  %v4812_v27 = vld [vmem:[%s6474_s8 + $0x48] ss:$28 sps:$4 sm:$0xff]   ;;  %v4816_v28 = vld [vmem:[%s6474_s8 + $0x50] ss:$28 sps:$4 sm:$0xff]  }
 0x3e5   :  { %v6076_v41 = vpack.c.bf16 %v2201_v33, %v2201_v33  ;;  %v6196_v23 = vpack.c.bf16 %v2203_v20, %v2203_v20  ;;  %v4819_v29 = vld [vmem:[%s6474_s8 + $0x84] ss:$28 sps:$4 sm:$0xff]   ;;  %v4824_v33 = vld [vmem:[%s6474_s8 + $0xbc] ss:$28 sps:$4 sm:$0xff]   ;;  %v4865_v9 = vld [vmem:[%s6474_s8 + $0x2b4] ss:$28 sps:$4 sm:$0xff]  }
 0x3e6   :  { %v6068_v38 = vpack.c.bf16 %v2202_v36, %v2202_v36  ;;  %v6086_v44 = vpack.c.bf16 %v2204_v37, %v2204_v37  ;;  %v4820_v30 = vld [vmem:[%s6474_s8 + $0x248] ss:$28 sps:$4 sm:$0xff]   ;;  %v4817_v31 = vld [vmem:[%s6474_s8 + $0x80] ss:$28 sps:$4 sm:$0xff]   ;;  %v4822_v35 = vld [vmem:[%s6474_s8 + $0xb8] ss:$28 sps:$4 sm:$0xff]  }
 0x3e7   :  { %v4821_v32 = vld [vmem:[%s6474_s8 + $0x88] ss:$28 sps:$4 sm:$0xff]   ;;  %v4825_v34 = vld [vmem:[%s6474_s8 + $0x280] ss:$28 sps:$4 sm:$0xff]   ;;  %v4829_v37 = vld [vmem:[%s6474_s8 + $0xf4] ss:$28 sps:$4 sm:$0xff]  }
 0x3e8   :  { %3381 = vmatprep.mubr.bf16.mxu0 %v6068_v38  ;;  %3463 = vmatprep.mubr.bf16.mxu1 %v6068_v38  ;;  %v4826_v36 = vld [vmem:[%s6474_s8 + $0xc0] ss:$28 sps:$4 sm:$0xff]   ;;  %v4870_v14 = vld [vmem:[%s6474_s8 + $0x4b0] ss:$28 sps:$4 sm:$0xff]   ;;  %v4875_v20 = vld [vmem:[%s6474_s8 + $0x358] ss:$28 sps:$4 sm:$0xff]  }
 0x3e9   :  { %3382 = vmatmul.mubr.bf16.vlgmr.msra.gmra.mrb[12].mxu0 %v6076_v41  ;;  %3464 = vmatmul.mubr.bf16.vlgmr.msra.gmra.mrb[16].mxu1 %v6076_v41 }
 0x3ea   :  { %3391 = vmatpush1.bf16.msra.mxu0 %v4753_v39  ;;  %3473 = vmatpush1.bf16.msra.mxu1 %v4756_v40  ;;  %v4827_v39 = vld [vmem:[%s6474_s8 + $0xf0] ss:$28 sps:$4 sm:$0xff]   ;;  %v4831_v40 = vld [vmem:[%s6474_s8 + $0xf8] ss:$28 sps:$4 sm:$0xff]  }
 0x3eb   :  { %4181 = vmatprep.mubr.msk.bf16.mxu0 %vm1265_vm0, %v6086_v44  ;;  %4182 = vmatprep.mubr.msk.bf16.mxu1 %vm1265_vm0, %v6086_v44 }
 0x3ec   :  { %3392 = vmatprep.subr.bf16.mxu0 %v4761_v42  ;;  %3474 = vmatprep.subr.bf16.mxu1 %v4764_v43  ;;  %v4834_v42 = vld [vmem:[%s6474_s8 + $0x12c] ss:$28 sps:$4 sm:$0xff]  }
 0x3ed   :  { %v4835_v43 = vld [vmem:[%s6474_s8 + $0x2f0] ss:$28 sps:$4 sm:$0xff]  }
 0x3ee   :  { %3393 = vmatpush1.bf16.msra.mxu0 %v4759_v45  ;;  %3475 = vmatpush1.bf16.msra.mxu1 %v4762_v46  ;;  %v4832_v45 = vld [vmem:[%s6474_s8 + $0x128] ss:$28 sps:$4 sm:$0xff]   ;;  %v4836_v46 = vld [vmem:[%s6474_s8 + $0x130] ss:$28 sps:$4 sm:$0xff]  }
 0x3ef   :  { %3394 = vmatprep.subr.bf16.mxu0 %v4767_v47  ;;  %3476 = vmatprep.subr.bf16.mxu1 %v4770_v48  ;;  %v4839_v47 = vld [vmem:[%s6474_s8 + $0x164] ss:$28 sps:$4 sm:$0xff]  }
 0x3f0   :  { %v4840_v48 = vld [vmem:[%s6474_s8 + $0x328] ss:$28 sps:$4 sm:$0xff]  }
 0x3f2   :  { %3395 = vmatpush1.bf16.msra.mxu0 %v4765_v51  ;;  %3477 = vmatpush1.bf16.msra.mxu1 %v4768_v53  ;;  %v4837_v51 = vld [vmem:[%s6474_s8 + $0x160] ss:$28 sps:$4 sm:$0xff]   ;;  %v4841_v53 = vld [vmem:[%s6474_s8 + $0x168] ss:$28 sps:$4 sm:$0xff]  }
 0x3f3   :  { %3396 = vmatprep.subr.bf16.mxu0 %v4773_v54  ;;  %3478 = vmatprep.subr.bf16.mxu1 %v4776_v55  ;;  %v4844_v54 = vld [vmem:[%s6474_s8 + $0x19c] ss:$28 sps:$4 sm:$0xff]  }
 0x3f4   :  { %v4845_v55 = vld [vmem:[%s6474_s8 + $0x360] ss:$28 sps:$4 sm:$0xff]  }
 0x3f6   :  { %3397 = vmatpush1.bf16.msra.mxu0 %v4771_v56  ;;  %3479 = vmatpush1.bf16.msra.mxu1 %v4774_v57  ;;  %v4842_v56 = vld [vmem:[%s6474_s8 + $0x198] ss:$28 sps:$4 sm:$0xff]   ;;  %v4846_v57 = vld [vmem:[%s6474_s8 + $0x1a0] ss:$28 sps:$4 sm:$0xff]  }
 0x3f7   :  { %3398 = vmatprep.subr.bf16.mxu0 %v4779_v58  ;;  %3480 = vmatprep.subr.bf16.mxu1 %v4782_v59  ;;  %v4849_v58 = vld [vmem:[%s6474_s8 + $0x1d4] ss:$28 sps:$4 sm:$0xff]  }
 0x3f8   :  { %v4847_v59 = vld [vmem:[%s6474_s8 + $0x1d0] ss:$28 sps:$4 sm:$0xff]  }
 0x3fa   :  { %3399 = vmatpush1.bf16.msra.mxu0 %v4777_v60  ;;  %3481 = vmatpush1.bf16.msra.mxu1 %v4780_v61  ;;  %v4850_v60 = vld [vmem:[%s6474_s8 + $0x398] ss:$28 sps:$4 sm:$0xff]   ;;  %v4853_v61 = vld [vmem:[%s6474_s8 + $0x20c] ss:$28 sps:$4 sm:$0xff]  }
 0x3fb   :  { %3400 = vmatprep.subr.bf16.mxu0 %v4785_v62  ;;  %3482 = vmatprep.subr.bf16.mxu1 %v4788_v63  ;;  %v4851_v62 = vld [vmem:[%s6474_s8 + $0x208] ss:$28 sps:$4 sm:$0xff]   ;;  %v4854_v63 = vld [vmem:[%s6474_s8 + $0x3d0] ss:$28 sps:$4 sm:$0xff]  }
 0x3fe   :  { %3401 = vmatpush1.bf16.msra.mxu0 %v4783_v0  ;;  %3483 = vmatpush1.bf16.msra.mxu1 %v4786_v1  ;;  %v4857_v0 = vld [vmem:[%s6474_s8 + $0x244] ss:$28 sps:$4 sm:$0xff]  }
 0x3ff   :  { %3402 = vmatprep.subr.bf16.mxu0 %v4791_v3  ;;  %3484 = vmatprep.subr.bf16.mxu1 %v4794_v6  ;;  %v4855_v1 = vld [vmem:[%s6474_s8 + $0x240] ss:$28 sps:$4 sm:$0xff]   ;;  %v4858_v3 = vld [vmem:[%s6474_s8 + $0x408] ss:$28 sps:$4 sm:$0xff]  }
 0x400   :  { %v4861_v6 = vld [vmem:[%s6474_s8 + $0x27c] ss:$28 sps:$4 sm:$0xff]  }
 0x402   :  { %3403 = vmatpush1.bf16.msra.mxu0 %v4789_v7  ;;  %3485 = vmatpush1.bf16.msra.mxu1 %v4792_v8  ;;  %v4859_v7 = vld [vmem:[%s6474_s8 + $0x278] ss:$28 sps:$4 sm:$0xff]   ;;  %v4862_v8 = vld [vmem:[%s6474_s8 + $0x440] ss:$28 sps:$4 sm:$0xff]  }
 0x403   :  { %3404 = vmatprep.subr.bf16.mxu0 %v4797_v10  ;;  %3486 = vmatprep.subr.bf16.mxu1 %v4800_v11  ;;  %v4863_v10 = vld [vmem:[%s6474_s8 + $0x2b0] ss:$28 sps:$4 sm:$0xff]   ;;  %v4866_v11 = vld [vmem:[%s6474_s8 + $0x478] ss:$28 sps:$4 sm:$0xff]  }
 0x406   :  { %3405 = vmatpush1.bf16.msra.mxu0 %v4795_v12  ;;  %3487 = vmatpush1.bf16.msra.mxu1 %v4798_v13  ;;  %v4869_v12 = vld [vmem:[%s6474_s8 + $0x2ec] ss:$28 sps:$4 sm:$0xff]  }
 0x407   :  { %3406 = vmatprep.subr.bf16.mxu0 %v4803_v15  ;;  %3488 = vmatprep.subr.bf16.mxu1 %v4806_v17  ;;  %v4867_v13 = vld [vmem:[%s6474_s8 + $0x2e8] ss:$28 sps:$4 sm:$0xff]   ;;  %v4871_v17 = vld [vmem:[%s6474_s8 + $0x320] ss:$28 sps:$4 sm:$0xff]  }
 0x408   :  { %v4873_v15 = vld [vmem:[%s6474_s8 + $0x324] ss:$28 sps:$4 sm:$0xff]  }
 0x40a   :  { %3407 = vmatpush1.bf16.msra.mxu0 %v4801_v18  ;;  %3489 = vmatpush1.bf16.msra.mxu1 %v4804_v19  ;;  %v4874_v18 = vld [vmem:[%s6474_s8 + $0x4e8] ss:$28 sps:$4 sm:$0xff]   ;;  %v4877_v19 = vld [vmem:[%s6474_s8 + $0x35c] ss:$28 sps:$4 sm:$0xff]  }
 0x40b   :  { %3513 = vmatprep.subr.bf16.mxu0 %v4809_v21  ;;  %4214 = vmatprep.subr.bf16.mxu1 %v4810_v16  ;;  %v4878_v21 = vld [vmem:[%s6474_s8 + $0x520] ss:$28 sps:$4 sm:$0xff]   ;;  %v4881_v16 = vld [vmem:[%s6474_s8 + $0x394] ss:$28 sps:$4 sm:$0xff]  }
 0x40d   :  { %3423 = vmatmul.mubr.bf16.vlgmr.msra.gmra.mrb[12].mxu0 %v6196_v23  ;;  %3505 = vmatmul.mubr.bf16.vlgmr.msra.gmra.mrb[16].mxu1 %v6196_v23 }
 0x40e   :  { %3514 = vmatpush1.bf16.msra.mxu0 %v4807_v22  ;;  %3545 = vmatprep.mubr.bf16.mxu0 %v6068_v38  ;;  %v4879_v22 = vld [vmem:[%s6474_s8 + $0x390] ss:$28 sps:$4 sm:$0xff]  }
 0x40f   :  { %4215 = vmatpush3.bf16.msra.mxu1 %v4811_v24  ;;  %3627 = vmatprep.mubr.bf16.mxu1 %v6068_v38  ;;  %v4830_v38 = vld [vmem:[%s6474_s8 + $0x2b8] ss:$28 sps:$4 sm:$0xff]  }
 0x410   :  { %3515 = vmatprep.subr.bf16.mxu0 %v4814_v25  ;;  %4216 = vmatprep.subr.bf16.mxu1 %v4815_v26  ;;  %v4882_v24 = vld [vmem:[%s6474_s8 + $0x558] ss:$28 sps:$4 sm:$0xff]   ;;  %v4885_v25 = vld [vmem:[%s6474_s8 + $0x3cc] ss:$28 sps:$4 sm:$0xff]  }
 0x411   :  { %v4883_v26 = vld [vmem:[%s6474_s8 + $0x3c8] ss:$28 sps:$4 sm:$0xff]  }
 0x412   :  { %3516 = vmatpush1.bf16.msra.mxu0 %v4812_v27  ;;  %v4888_v27 = vld [vmem:[%s6474_s8 + $0x404] ss:$28 sps:$4 sm:$0xff]  }
 0x413   :  { %4217 = vmatpush3.bf16.msra.mxu1 %v4816_v28  ;;  %3517 = vmatprep.subr.bf16.mxu0 %v4819_v29  ;;  %v4894_v28 = vld [vmem:[%s6474_s8 + $0x474] ss:$28 sps:$4 sm:$0xff]  }
 0x414   :  { %4218 = vmatprep.subr.bf16.mxu1 %v4820_v30  ;;  %v4892_v29 = vld [vmem:[%s6474_s8 + $0x470] ss:$28 sps:$4 sm:$0xff]  }
 0x415   :  { %v4897_v30 = vld [vmem:[%s6474_s8 + $0x4ac] ss:$28 sps:$4 sm:$0xff]  }
 0x416   :  { %3518 = vmatpush1.bf16.msra.mxu0 %v4817_v31  ;;  %v4895_v31 = vld [vmem:[%s6474_s8 + $0x4a8] ss:$28 sps:$4 sm:$0xff]  }
 0x417   :  { %4219 = vmatpush3.bf16.msra.mxu1 %v4821_v32  ;;  %3519 = vmatprep.subr.bf16.mxu0 %v4824_v33  ;;  %v4900_v32 = vld [vmem:[%s6474_s8 + $0x4e4] ss:$28 sps:$4 sm:$0xff]  }
 0x418   :  { %4220 = vmatprep.subr.bf16.mxu1 %v4825_v34  ;;  %v4898_v33 = vld [vmem:[%s6474_s8 + $0x4e0] ss:$28 sps:$4 sm:$0xff]  }
 0x419   :  { %v4903_v34 = vld [vmem:[%s6474_s8 + $0x51c] ss:$28 sps:$4 sm:$0xff]  }
 0x41a   :  { %3520 = vmatpush1.bf16.msra.mxu0 %v4822_v35  ;;  %v4901_v35 = vld [vmem:[%s6474_s8 + $0x518] ss:$28 sps:$4 sm:$0xff]  }
 0x41b   :  { %4221 = vmatpush3.bf16.msra.mxu1 %v4826_v36  ;;  %3521 = vmatprep.subr.bf16.mxu0 %v4829_v37  ;;  %v4906_v36 = vld [vmem:[%s6474_s8 + $0x554] ss:$28 sps:$4 sm:$0xff]  }
 0x41c   :  { %4222 = vmatprep.subr.bf16.mxu1 %v4830_v38  ;;  %v4904_v37 = vld [vmem:[%s6474_s8 + $0x550] ss:$28 sps:$4 sm:$0xff]   ;;  %v6438_v38 = vld [vmem:[%s6475_s9] sm:$0xff] }
 0x41e   :  { %3522 = vmatpush1.bf16.msra.mxu0 %v4827_v39  ;;  %v2414_v39 = vrot.slane %v6438_v38, %v5731_v50 }
 0x41f   :  { %4223 = vmatpush3.bf16.msra.mxu1 %v4831_v40  ;;  %3523 = vmatprep.subr.bf16.mxu0 %v4834_v42  ;;  %v2422_v40 = vrot.slane %v6438_v38, %v5742_v4  ;;  %v2418_v42 = vrot.slane %v6438_v38, %v5737_v52 }
 0x420   :  { %4224 = vmatprep.subr.bf16.mxu1 %v4835_v43  ;;  %v2426_v43 = vrot.slane %v6438_v38, %v5745_v5 }
 0x422   :  { %3524 = vmatpush1.bf16.msra.mxu0 %v4832_v45 }
 0x423   :  { %4225 = vmatpush3.bf16.msra.mxu1 %v4836_v46  ;;  %3525 = vmatprep.subr.bf16.mxu0 %v4839_v47 }
 0x424   :  { %4226 = vmatprep.subr.bf16.mxu1 %v4840_v48 }
 0x426   :  { %3526 = vmatpush1.bf16.msra.mxu0 %v4837_v51 }
 0x427   :  { %4227 = vmatpush3.bf16.msra.mxu1 %v4841_v53  ;;  %3527 = vmatprep.subr.bf16.mxu0 %v4844_v54 }
 0x428   :  { %4228 = vmatprep.subr.bf16.mxu1 %v4845_v55 }
 0x42a   :  { %3528 = vmatpush1.bf16.msra.mxu0 %v4842_v56 }
 0x42b   :  { %4229 = vmatpush3.bf16.msra.mxu1 %v4846_v57  ;;  %3529 = vmatprep.subr.bf16.mxu0 %v4849_v58 }
 0x42c   :  { %3635 = vmatprep.subr.bf16.mxu1 %v4962_v2 }
 0x42e   :  { %3628 = vmatmul.mubr.bf16.vlgmr.msra.gmra.mrb[20].mxu1 %v6076_v41  ;;  %3530 = vmatpush1.bf16.msra.mxu0 %v4847_v59 }
 0x42f   :  { %3636 = vmatpush1.bf16.msra.mxu1 %v4850_v60  ;;  %4184 = vmatprep.mubr.msk.bf16.mxu1 %vm1265_vm0, %v6086_v44 }
 0x430   :  { %3531 = vmatprep.subr.bf16.mxu0 %v4853_v61  ;;  %3637 = vmatprep.subr.bf16.mxu1 %v4962_v2 }
 0x432   :  { %3532 = vmatpush1.bf16.msra.mxu0 %v4851_v62 }
 0x433   :  { %3638 = vmatpush1.bf16.msra.mxu1 %v4854_v63  ;;  %3533 = vmatprep.subr.bf16.mxu0 %v4857_v0 }
 0x434   :  { %3639 = vmatprep.subr.bf16.mxu1 %v4962_v2 }
 0x436   :  { %3534 = vmatpush1.bf16.msra.mxu0 %v4855_v1 }
 0x437   :  { %3640 = vmatpush1.bf16.msra.mxu1 %v4858_v3  ;;  %3535 = vmatprep.subr.bf16.mxu0 %v4861_v6 }
 0x438   :  { %3641 = vmatprep.subr.bf16.mxu1 %v4962_v2 }
 0x43a   :  { %3536 = vmatpush1.bf16.msra.mxu0 %v4859_v7 }
 0x43b   :  { %3642 = vmatpush1.bf16.msra.mxu1 %v4862_v8  ;;  %3537 = vmatprep.subr.bf16.mxu0 %v4865_v9 }
 0x43c   :  { %3643 = vmatprep.subr.bf16.mxu1 %v4962_v2 }
 0x43e   :  { %3538 = vmatpush1.bf16.msra.mxu0 %v4863_v10 }
 0x43f   :  { %3644 = vmatpush1.bf16.msra.mxu1 %v4866_v11  ;;  %3539 = vmatprep.subr.bf16.mxu0 %v4869_v12 }
 0x440   :  { %3645 = vmatprep.subr.bf16.mxu1 %v4962_v2 }
 0x442   :  { %3540 = vmatpush1.bf16.msra.mxu0 %v4867_v13 }
 0x443   :  { %3646 = vmatpush1.bf16.msra.mxu1 %v4870_v14  ;;  %3541 = vmatprep.subr.bf16.mxu0 %v4873_v15  ;;  %v2437_v15 = vsub.s32 6, %v5728_v49 }
 0x444   :  { %3647 = vmatprep.subr.bf16.mxu1 %v4962_v2 }
 0x446   :  { %3542 = vmatpush1.bf16.msra.mxu0 %v4871_v17  ;;  %v2438_v17 = vrot.slane %v6438_v38, %v2437_v15 }
 0x447   :  { %3648 = vmatpush1.bf16.msra.mxu1 %v4874_v18  ;;  %3543 = vmatprep.subr.bf16.mxu0 %v4877_v19 }
 0x448   :  { %3649 = vmatprep.subr.bf16.mxu1 %v4962_v2 }
 0x44a   :  { %3544 = vmatpush1.bf16.msra.mxu0 %v4875_v20 }
 0x44b   :  { %3650 = vmatpush1.bf16.msra.mxu1 %v4878_v21  ;;  %3554 = vmatprep.subr.bf16.mxu0 %v4881_v16 }
 0x44c   :  { %3651 = vmatprep.subr.bf16.mxu1 %v4962_v2  ;;  %v4886_v2 = vld [vmem:[%s6474_s8 + $0x400] ss:$28 sps:$4 sm:$0xff]  }
 0x44d   :  { %3546 = vmatmul.mubr.bf16.vlgmr.msra.gmra.mrb[16].mxu0 %v6076_v41  ;;  %v4891_v41 = vld [vmem:[%s6474_s8 + $0x43c] ss:$28 sps:$4 sm:$0xff]  }
 0x44e   :  { %3555 = vmatpush1.bf16.msra.mxu0 %v4879_v22  ;;  %4183 = vmatprep.mubr.msk.bf16.mxu0 %vm1265_vm0, %v6086_v44  ;;  %v4889_v44 = vld [vmem:[%s6474_s8 + $0x438] ss:$28 sps:$4 sm:$0xff]   ;;  %s4964_s8 = smov [#allocation2]  }
 0x44f   :  { %3652 = vmatpush1.bf16.msra.mxu1 %v4882_v24  ;;  %3556 = vmatprep.subr.bf16.mxu0 %v4885_v25  ;;  %s3730_s9 = sshll.u32 %s4964_s8, 4  ;;  %s3731_s9 = int_to_ptr.vmem [resolvable:$true] %s3730_s9 }
 0x450   :  { %s4938_s27 = scalar_lea.vmem %s3731_s9, 896  ;;  %p4943_p1 = scmp.lt.s32.totalorder %s3731_s9, %s3731_s9 }
 0x451   :  { %p4939_p0 = scmp.ne.s32.totalorder %s3731_s9, %s4938_s27  ;;  %p4944_p2 = scmp.lt.s32.totalorder %s4938_s27, %s4938_s27 }
 0x452   :  { %3668 = vmatmul.mubr.bf16.vlgmr.msra.gmra.mrb[24].mxu1 %v6196_v23  ;;  %3557 = vmatpush1.bf16.msra.mxu0 %v4883_v26 }
 0x453   :  { %3558 = vmatprep.subr.bf16.mxu0 %v4888_v27  ;;  %v2429_v27 = vsub.s32 4, %v5728_v49  ;;  %p4945_p3 = por %p4944_p2, %p4943_p1 }
 0x455   :  { %p4946_p4 = pnand %p4945_p3, %p4939_p0 }
 0x456   :  { %3559 = vmatpush1.bf16.msra.mxu0 %v4886_v2  ;;  %v2433_v2 = vsub.s32 5, %v5728_v49 }
 0x457   :  { %3560 = vmatprep.subr.bf16.mxu0 %v4891_v41 }
 0x45a   :  { %3561 = vmatpush1.bf16.msra.mxu0 %v4889_v44  ;;  %v2430_v44 = vrot.slane %v6438_v38, %v2429_v27 }
 0x45b   :  { %3562 = vmatprep.subr.bf16.mxu0 %v4894_v28  ;;  %v2434_v28 = vrot.slane %v6438_v38, %v2433_v2 }
 0x45e   :  { %3563 = vmatpush1.bf16.msra.mxu0 %v4892_v29 }
 0x45f   :  { %3564 = vmatprep.subr.bf16.mxu0 %v4897_v30 }
 0x462   :  { %3565 = vmatpush1.bf16.msra.mxu0 %v4895_v31 }
 0x463   :  { %3566 = vmatprep.subr.bf16.mxu0 %v4900_v32 }
 0x466   :  { %3567 = vmatpush1.bf16.msra.mxu0 %v4898_v33 }
 0x467   :  { %3568 = vmatprep.subr.bf16.mxu0 %v4903_v34 }
 0x46a   :  { %3569 = vmatpush1.bf16.msra.mxu0 %v4901_v35 }
 0x46b   :  { %3570 = vmatprep.subr.bf16.mxu0 %v4906_v36 }
 0x46e   :  { %3571 = vmatpush1.bf16.msra.mxu0 %v4904_v37 }
 0x471   :  { %3587 = vmatmul.mubr.bf16.vlgmr.msra.gmra.mrb[16].mxu0 %v6196_v23 }
 0x4e0   :  { %v3424_v45 = vpop.f32.mrb[12].mxu0  ;;  %v3506_v46 = vpop.f32.mrb[16].mxu1 }
 0x4e1   :  { %v4242_v23 = vadd.f32 %v3424_v45, %v2414_v39  ;;  %v4244_v47 = vadd.f32 %v3506_v46, %v2422_v40  ;;  %v3426_v48 = vpop.f32.mrb[13].mxu0  ;;  %v3508_v51 = vpop.f32.mrb[17].mxu1 }
 0x4e2   :  { %v4243_v53 = vadd.f32 %v3426_v48, %v2418_v42  ;;  %v4245_v54 = vadd.f32 %v3508_v51, %v2426_v43  ;;  %v3428_v55 = vpop.f32.mrb[14].mxu0  ;;  %v3510_v56 = vpop.f32.mrb[18].mxu1 }
 0x4e3   :  { %v4185_v50 = vmul.f32 -1.442695, %v4242_v23  ;;  %v4187_v57 = vmul.f32 -1.442695, %v4244_v47  ;;  %v3429_v58 = vpop.f32.mrb[15].mxu0  ;;  %v3511_v4 = vpop.f32.mrb[19].mxu1 }
 0x4e4   :  { %v4186_v59 = vmul.f32 -1.442695, %v4243_v53  ;;  %v4188_v60 = vmul.f32 -1.442695, %v4245_v54 }
 0x4e5   :  { %4909 = vpow2.f32 %v4185_v50 }
 0x4e6   :  { %4911 = vpow2.f32 %v4187_v57 }
 0x4e7   :  { %4913 = vpow2.f32 %v4186_v59 }
 0x4e8   :  { %4915 = vpow2.f32 %v4188_v60 }
 0x4ef   :  { %v4910_v52 = vpop.eup %4909 }
 0x4f0   :  { %v4912_v5 = vpop.eup %4911  ;;  %v3696_v61 = vadd.f32 1.0, %v4910_v52 }
 0x4f1   :  { %v4914_v62 = vpop.eup %4913  ;;  %v3698_v63 = vadd.f32 1.0, %v4912_v5 }
 0x4f2   :  { %v4916_v0 = vpop.eup %4915  ;;  %4917 = vrcp.f32 %v3696_v61  ;;  %v3697_v1 = vadd.f32 1.0, %v4914_v62 }
 0x4f3   :  { %4919 = vrcp.f32 %v3698_v63  ;;  %v3699_v3 = vadd.f32 1.0, %v4916_v0 }
 0x4f4   :  { %4921 = vrcp.f32 %v3697_v1 }
 0x4f5   :  { %4923 = vrcp.f32 %v3699_v3 }
 0x4fc   :  { %v4918_v6 = vpop.eup %4917 }
 0x4fd   :  { %v4920_v7 = vpop.eup %4919  ;;  %3717 = vst [vmem:[#allocation2] sm:$0xff] %v4918_v6 }
 0x4fe   :  { %v4922_v8 = vpop.eup %4921  ;;  %3719 = vst [vmem:[#allocation2 + $0x10] sm:$0xff] %v4920_v7 }
 0x4ff   :  { %v4924_v9 = vpop.eup %4923  ;;  %3718 = vst [vmem:[#allocation2 + $0x8] sm:$0xff] %v4922_v8 }
 0x500   :  { %3720 = vst [vmem:[#allocation2 + $0x18] sm:$0xff] %v4924_v9 }
 0x501   :  { %v4230_v10 = vpop.f32.mrb[20].mxu1 }
 0x502   :  { %v4231_v11 = vpop.f32.mrb[21].mxu1 }
 0x503   :  { %v4232_v12 = vadd.f32 %v4231_v11, %v4230_v10  ;;  %v4233_v13 = vpop.f32.mrb[22].mxu1 }
 0x504   :  { %v4234_v14 = vpop.f32.mrb[23].mxu1 }
 0x505   :  { %v3630_v18 = vadd.f32 %v4232_v12, %v2438_v17 }
 0x525   :  { %v3669_v19 = vpop.f32.mrb[24].mxu1 }
 0x526   :  { %v3670_v20 = vadd.f32 %v3669_v19, %v3630_v18  ;;  %v3671_v21 = vpop.f32.mrb[25].mxu1 }
 0x527   :  { %v3672_v16 = vpop.f32.mrb[26].mxu1 }
 0x528   :  { %v4191_v22 = vmul.f32 -1.442695, %v3670_v20  ;;  %v3673_v24 = vpop.f32.mrb[27].mxu1 }
 0x52a   :  { %4925 = vpow2.f32 %v4191_v22 }
 0x534   :  { %v4926_v25 = vpop.eup %4925 }
 0x535   :  { %v3702_v26 = vadd.f32 1.0, %v4926_v25 }
 0x537   :  { %4927 = vrcp.f32 %v3702_v26 }
 0x541   :  { %v4928_v41 = vpop.eup %4927 }
 0x542   :  { %3723 = vst [vmem:[#allocation2 + $0x30] sm:$0xff] %v4928_v41 }
 0x544   :  { %v3588_v29 = vpop.f32.mrb[16].mxu0 }
 0x545   :  { %v4246_v30 = vadd.f32 %v3588_v29, %v2430_v44  ;;  %v3590_v31 = vpop.f32.mrb[17].mxu0 }
 0x546   :  { %v4247_v32 = vadd.f32 %v3590_v31, %v2434_v28  ;;  %v3592_v33 = vpop.f32.mrb[18].mxu0 }
 0x547   :  { %v4189_v34 = vmul.f32 -1.442695, %v4246_v30  ;;  %v3593_v35 = vpop.f32.mrb[19].mxu0 }
 0x548   :  { %v4190_v36 = vmul.f32 -1.442695, %v4247_v32 }
 0x549   :  { %4929 = vpow2.f32 %v4189_v34 }
 0x54a   :  { %4931 = vpow2.f32 %v4190_v36 }
 0x553   :  { %v4930_v37 = vpop.eup %4929 }
 0x554   :  { %v4932_v39 = vpop.eup %4931  ;;  %v3700_v40 = vadd.f32 1.0, %v4930_v37 }
 0x555   :  { %v3701_v49 = vadd.f32 1.0, %v4932_v39 }
 0x556   :  { %4933 = vrcp.f32 %v3700_v40 }
 0x557   :  { %4935 = vrcp.f32 %v3701_v49 }
 0x560   :  { %v4934_v42 = vpop.eup %4933 }
 0x561   :  { %v4936_v38 = vpop.eup %4935  ;;  %3721 = vst [vmem:[#allocation2 + $0x20] sm:$0xff] %v4934_v42 }
 0x562   :  { %3722 = vst [vmem:[#allocation2 + $0x28] sm:$0xff] %v4936_v38 }
 0x563   :  { %4949 = shalt.err (!%p4946_p4)
}
 0x564   :  { %s4950_s29 = scalar_lea.hbm %s6476_s10, 896 }
 0x565   :  { %p4951_p5 = scmp.ne.s32.totalorder %s6476_s10, %s4950_s29  ;;  %p4954_p6 = scmp.lt.u32.totalorder %s4950_s29, %s6476_s10 }
 0x567   :  { %p4956_p7 = pnand %p4954_p6, %p4951_p5 }
 0x569   :  { %4959 = shalt.err (!%p4956_p7)
}
 0x56a   :  { %3733 = dma.vmem_to_hbm [thread:$0]  %s3731_s9, 896, %s6476_s10, [#allocation3]  }
 0x56b   :  { %4960 = dma.done.wait [#allocation3], 896  }
 0x56c   :  { %4961 = vsyncadd [#allocation3], 4294966400 }
 0x56d   :  { %3741 = vsyncpa [#allocation3], 1 }

</bundles_post_ra>
